<compile_context>
chip_gen: v7x
topology: tpu7x:2x2x1
jax: 0.10.0
libtpu: 0.0.40
codegen_flags: <defaults>
</compile_context>

<pallas_src>
import jax
import jax.numpy as jnp
import numpy as np
from jax.experimental import pallas as pl
from jax.experimental.pallas import tpu as pltpu


# ---------------------------------------------------------------------------
# Fused kernel: hoisted input projection + GRU recurrence (h in vregs) + FC.
# All weights are pre-transposed, gate-stacked [r | z | n] and lane-padded to
# 128 lanes per gate (zero padding).
# ---------------------------------------------------------------------------
def _gru_fc_kernel(x_ref, w_ih_ref, w_hh_ref, gi_b_ref, b_hn_ref,
                   w_fc_ref, b_fc_ref, out_ref):
    B, T, _ = x_ref.shape
    Hp = w_hh_ref.shape[0]            # padded hidden width (multiple of 128)

    # Loads hoisted out of the recurrence (each read once).
    w_hh = w_hh_ref[...]              # (Hp, 3*Hp), rows >= H are zero
    b_hn_b = jnp.broadcast_to(b_hn_ref[...], (B, Hp))   # hoisted broadcast

    # ---- Hoisted input projection: ONE MXU matmul for all T time steps, with
    # b_ih and the r/z slices of b_hh already folded into gi_b (off the chain).
    x_flat = x_ref[...].reshape(B * T, -1)                        # (B*T, I)
    gi_all = jnp.dot(x_flat, w_ih_ref[...],
                     preferred_element_type=jnp.float32) + gi_b_ref[...]
    gi3 = gi_all.reshape(B, T, 3 * Hp)                            # (B, T, 3*Hp)

    # ---- Time recurrence: fully unrolled straight-line code; h stays in vregs.
    # gi3[:, t, :] has no dependence on h, so these slices sit off the serial
    # h -> gh -> gates -> h chain and can be scheduled ahead of it.
    h = jnp.zeros((B, Hp), jnp.float32)
    for t in range(T):
        gi = gi3[:, t, :]                                         # (B, 3*Hp) static slice
        gh = jnp.dot(h, w_hh, preferred_element_type=jnp.float32)  # (B, 3*Hp)
        r = jax.nn.sigmoid(gi[:, :Hp] + gh[:, :Hp])
        z = jax.nn.sigmoid(gi[:, Hp:2 * Hp] + gh[:, Hp:2 * Hp])
        n = jnp.tanh(gi[:, 2 * Hp:] + r * (gh[:, 2 * Hp:] + b_hn_b))
        h = n + z * (h - n)           # == (1 - z) * n + z * h, one fewer VPU op

    # ---- Fused FC head; single output store.
    logits = jnp.dot(h, w_fc_ref[...],
                     preferred_element_type=jnp.float32) + b_fc_ref[...]
    out_ref[...] = logits.astype(out_ref.dtype)


# ---------------------------------------------------------------------------
# Wrapper: batch-first (B, T, I) input, exactly like the PyTorch module.
# No wrapper-side transpose; everything happens inside the single pallas_call.
# ---------------------------------------------------------------------------
@jax.jit
def forward(x_bti, params):
    w_ih_p, w_hh_p, gi_b_p, b_hn_p, w_fc_p, b_fc_p = params
    B = x_bti.shape[0]
    C = w_fc_p.shape[-1]
    vmem = pl.BlockSpec(memory_space=pltpu.MemorySpace.VMEM)
    return pl.pallas_call(
        _gru_fc_kernel,
        out_shape=jax.ShapeDtypeStruct((B, C), jnp.float32),
        in_specs=[vmem] * 7,
        out_specs=vmem,
    )(x_bti, w_ih_p, w_hh_p, gi_b_p, b_hn_p, w_fc_p, b_fc_p)


# ---------------------------------------------------------------------------
# One-time parameter preparation: PyTorch layout -> transposed, gate-stacked,
# lane-padded (zeros outside the valid H rows/lanes), biases pre-folded.
# ---------------------------------------------------------------------------
def prepare_params(w_ih, w_hh, b_ih, b_hh, fc_w, fc_b, hidden_size, lane=128):
    H = hidden_size
    I = w_ih.shape[1]
    C = fc_w.shape[0]
    Hp = max(lane, ((H + lane - 1) // lane) * lane)

    w_ih = np.asarray(w_ih); w_hh = np.asarray(w_hh)
    b_ih = np.asarray(b_ih); b_hh = np.asarray(b_hh)
    fc_w = np.asarray(fc_w); fc_b = np.asarray(fc_b)

    w_ih_p = np.zeros((I, 3 * Hp), np.float32)
    w_hh_p = np.zeros((Hp, 3 * Hp), np.float32)   # padded rows MUST stay zero
    gi_b_p = np.zeros((1, 3 * Hp), np.float32)
    b_hn_p = np.zeros((1, Hp), np.float32)

    for g in range(3):                            # gate order [r | z | n]
        wi_g = w_ih[g * H:(g + 1) * H]            # (H, I)
        wh_g = w_hh[g * H:(g + 1) * H]            # (H, H)
        bi_g = b_ih[g * H:(g + 1) * H]
        bh_g = b_hh[g * H:(g + 1) * H]
        w_ih_p[:, g * Hp:g * Hp + H] = wi_g.T
        w_hh_p[:H, g * Hp:g * Hp + H] = wh_g.T
        gi_b_p[0, g * Hp:g * Hp + H] = bi_g
        if g < 2:                                 # fold b_hr / b_hz out of the loop
            gi_b_p[0, g * Hp:g * Hp + H] += bh_g
        else:                                     # b_hn must stay inside r * (...)
            b_hn_p[0, :H] = bh_g

    w_fc_p = np.zeros((Hp, C), np.float32)        # padded rows MUST stay zero
    w_fc_p[:H, :] = fc_w.T
    b_fc_p = fc_b.reshape(1, C).astype(np.float32)

    return tuple(jnp.asarray(a) for a in
                 (w_ih_p, w_hh_p, gi_b_p, b_hn_p, w_fc_p, b_fc_p))


# ---------------------------------------------------------------------------
# Pure-JAX reference on the RAW (PyTorch-layout) parameters.
# ---------------------------------------------------------------------------
def forward_ref(x, w_ih, w_hh, b_ih, b_hh, fc_w, fc_b):
    B, T, _ = x.shape
    H = w_hh.shape[1]
    hp = jax.lax.Precision.HIGHEST
    h = jnp.zeros((B, H), jnp.float32)
    for t in range(T):
        gi = jnp.dot(x[:, t, :], w_ih.T, precision=hp) + b_ih
        gh = jnp.dot(h, w_hh.T, precision=hp) + b_hh
        r = jax.nn.sigmoid(gi[:, :H] + gh[:, :H])
        z = jax.nn.sigmoid(gi[:, H:2 * H] + gh[:, H:2 * H])
        n = jnp.tanh(gi[:, 2 * H:] + r * gh[:, 2 * H:])
        h = (1.0 - z) * n + z * h
    return jnp.dot(h, fc_w.T, precision=hp) + fc_b          # (B, C)


# ---------------------------------------------------------------------------
if __name__ == "__main__":
    # Module hyperparameters (num_layers = 1, matching the PyTorch default).
    num_classes, input_size, hidden_size, seq_length = 3, 4, 32, 8
    batch = 2
    H = hidden_size

    key = jax.random.PRNGKey(0)
    ks = jax.random.split(key, 7)

    def uni(k, shape, bound):
        return jax.random.uniform(k, shape, jnp.float32, -bound, bound)

    kg = 1.0 / np.sqrt(H)
    # PyTorch-layout GRU / Linear parameters (gate order [r | z | n]).
    w_ih = uni(ks[0], (3 * H, input_size), kg)   # weight_ih_l0 (3H, I)
    w_hh = uni(ks[1], (3 * H, H), kg)            # weight_hh_l0 (3H, H)
    b_ih = uni(ks[2], (3 * H,), kg)              # bias_ih_l0
    b_hh = uni(ks[3], (3 * H,), kg)              # bias_hh_l0
    fc_w = uni(ks[4], (num_classes, H), kg)      # fc.weight (C, H)
    fc_b = uni(ks[5], (num_classes,), kg)        # fc.bias   (C,)

    x = jax.random.normal(ks[6], (batch, seq_length, input_size), jnp.float32)

    params = prepare_params(w_ih, w_hh, b_ih, b_hh, fc_w, fc_b, H)

    out = jax.block_until_ready(forward(x, params))
    assert out.shape == (batch, num_classes), out.shape

    ref = forward_ref(x, w_ih, w_hh, b_ih, b_hh, fc_w, fc_b)
    np.testing.assert_allclose(np.asarray(out), np.asarray(ref),
                               rtol=1e-4, atol=1e-4)

    print("KERNEL_OK")
</pallas_src>

<mosaic_0001>
module attributes {stable_mosaic.version = 11 : i64} {
  func.func @_gru_fc_kernel(%arg0: memref<2x8x4xf32, #tpu.memory_space<vmem>>, %arg1: memref<4x384xf32, #tpu.memory_space<vmem>>, %arg2: memref<128x384xf32, #tpu.memory_space<vmem>>, %arg3: memref<1x384xf32, #tpu.memory_space<vmem>>, %arg4: memref<1x128xf32, #tpu.memory_space<vmem>>, %arg5: memref<128x3xf32, #tpu.memory_space<vmem>>, %arg6: memref<1x3xf32, #tpu.memory_space<vmem>>, %arg7: memref<2x3xf32, #tpu.memory_space<vmem>>) attributes {dimension_semantics = [], scalar_prefetch = 0 : i64, scratch_operands = 0 : i64, tpu.core_type = #tpu.core_type<tc>} {
    %c0 = arith.constant 0 : index
    %c0_0 = arith.constant 0 : index
    %0 = vector.load %arg2[%c0, %c0_0] : memref<128x384xf32, #tpu.memory_space<vmem>>, vector<128x384xf32>
    %c0_1 = arith.constant 0 : index
    %c0_2 = arith.constant 0 : index
    %1 = vector.load %arg4[%c0_1, %c0_2] : memref<1x128xf32, #tpu.memory_space<vmem>>, vector<1x128xf32>
    %2 = vector.shape_cast %1 : vector<1x128xf32> to vector<1x128xf32>
    %3 = vector.broadcast %2 : vector<1x128xf32> to vector<2x128xf32>
    %c0_3 = arith.constant 0 : index
    %c0_4 = arith.constant 0 : index
    %c0_5 = arith.constant 0 : index
    %4 = vector.load %arg0[%c0_3, %c0_4, %c0_5] : memref<2x8x4xf32, #tpu.memory_space<vmem>>, vector<2x8x4xf32>
    %5 = vector.shape_cast %4 : vector<2x8x4xf32> to vector<16x4xf32>
    %c0_6 = arith.constant 0 : index
    %c0_7 = arith.constant 0 : index
    %6 = vector.load %arg1[%c0_6, %c0_7] : memref<4x384xf32, #tpu.memory_space<vmem>>, vector<4x384xf32>
    %cst = arith.constant dense<0.000000e+00> : vector<16x384xf32>
    %7 = tpu.matmul %5, %6, %cst {dimension_numbers = #tpu.dot_dimension_numbers<[1], [0], [0], [1], [0, 0, 1, 1], [], []>} : vector<16x4xf32>, vector<4x384xf32>, vector<16x384xf32> -> vector<16x384xf32>
    %c0_8 = arith.constant 0 : index
    %c0_9 = arith.constant 0 : index
    %8 = vector.load %arg3[%c0_8, %c0_9] : memref<1x384xf32, #tpu.memory_space<vmem>>, vector<1x384xf32>
    %9 = vector.broadcast %8 : vector<1x384xf32> to vector<16x384xf32>
    %10 = arith.addf %7, %9 : vector<16x384xf32>
    %11 = vector.shape_cast %10 : vector<16x384xf32> to vector<2x8x384xf32>
    %cst_10 = arith.constant 0.000000e+00 : f32
    %12 = vector.broadcast %cst_10 : f32 to vector<2x128xf32>
    %13 = vector.extract_strided_slice %11 {offsets = [0, 0, 0], sizes = [2, 1, 384], strides = [1, 1, 1]} : vector<2x8x384xf32> to vector<2x1x384xf32>
    %14 = vector.shape_cast %13 : vector<2x1x384xf32> to vector<2x384xf32>
    %cst_11 = arith.constant dense<0.000000e+00> : vector<2x384xf32>
    %15 = tpu.matmul %12, %0, %cst_11 {dimension_numbers = #tpu.dot_dimension_numbers<[1], [0], [0], [1], [0, 0, 1, 1], [], []>} : vector<2x128xf32>, vector<128x384xf32>, vector<2x384xf32> -> vector<2x384xf32>
    %16 = vector.extract_strided_slice %14 {offsets = [0, 0], sizes = [2, 128], strides = [1, 1]} : vector<2x384xf32> to vector<2x128xf32>
    %17 = vector.extract_strided_slice %15 {offsets = [0, 0], sizes = [2, 128], strides = [1, 1]} : vector<2x384xf32> to vector<2x128xf32>
    %18 = arith.addf %16, %17 : vector<2x128xf32>
    %19 = arith.negf %18 : vector<2x128xf32>
    %20 = math.exp %19 : vector<2x128xf32>
    %cst_12 = arith.constant 1.000000e+00 : f32
    %21 = vector.broadcast %cst_12 : f32 to vector<2x128xf32>
    %22 = arith.addf %21, %20 : vector<2x128xf32>
    %23 = arith.divf %21, %22 : vector<2x128xf32>
    %24 = vector.extract_strided_slice %14 {offsets = [0, 128], sizes = [2, 128], strides = [1, 1]} : vector<2x384xf32> to vector<2x128xf32>
    %25 = vector.extract_strided_slice %15 {offsets = [0, 128], sizes = [2, 128], strides = [1, 1]} : vector<2x384xf32> to vector<2x128xf32>
    %26 = arith.addf %24, %25 : vector<2x128xf32>
    %27 = arith.negf %26 : vector<2x128xf32>
    %28 = math.exp %27 : vector<2x128xf32>
    %cst_13 = arith.constant 1.000000e+00 : f32
    %29 = vector.broadcast %cst_13 : f32 to vector<2x128xf32>
    %30 = arith.addf %29, %28 : vector<2x128xf32>
    %31 = arith.divf %29, %30 : vector<2x128xf32>
    %32 = vector.extract_strided_slice %14 {offsets = [0, 256], sizes = [2, 128], strides = [1, 1]} : vector<2x384xf32> to vector<2x128xf32>
    %33 = vector.extract_strided_slice %15 {offsets = [0, 256], sizes = [2, 128], strides = [1, 1]} : vector<2x384xf32> to vector<2x128xf32>
    %34 = arith.addf %33, %3 : vector<2x128xf32>
    %35 = arith.mulf %23, %34 : vector<2x128xf32>
    %36 = arith.addf %32, %35 : vector<2x128xf32>
    %37 = math.tanh %36 : vector<2x128xf32>
    %38 = arith.subf %12, %37 : vector<2x128xf32>
    %39 = arith.mulf %31, %38 : vector<2x128xf32>
    %40 = arith.addf %37, %39 : vector<2x128xf32>
    %41 = vector.extract_strided_slice %11 {offsets = [0, 1, 0], sizes = [2, 1, 384], strides = [1, 1, 1]} : vector<2x8x384xf32> to vector<2x1x384xf32>
    %42 = vector.shape_cast %41 : vector<2x1x384xf32> to vector<2x384xf32>
    %cst_14 = arith.constant dense<0.000000e+00> : vector<2x384xf32>
    %43 = tpu.matmul %40, %0, %cst_14 {dimension_numbers = #tpu.dot_dimension_numbers<[1], [0], [0], [1], [0, 0, 1, 1], [], []>} : vector<2x128xf32>, vector<128x384xf32>, vector<2x384xf32> -> vector<2x384xf32>
    %44 = vector.extract_strided_slice %42 {offsets = [0, 0], sizes = [2, 128], strides = [1, 1]} : vector<2x384xf32> to vector<2x128xf32>
    %45 = vector.extract_strided_slice %43 {offsets = [0, 0], sizes = [2, 128], strides = [1, 1]} : vector<2x384xf32> to vector<2x128xf32>
    %46 = arith.addf %44, %45 : vector<2x128xf32>
    %47 = arith.negf %46 : vector<2x128xf32>
    %48 = math.exp %47 : vector<2x128xf32>
    %cst_15 = arith.constant 1.000000e+00 : f32
    %49 = vector.broadcast %cst_15 : f32 to vector<2x128xf32>
    %50 = arith.addf %49, %48 : vector<2x128xf32>
    %51 = arith.divf %49, %50 : vector<2x128xf32>
    %52 = vector.extract_strided_slice %42 {offsets = [0, 128], sizes = [2, 128], strides = [1, 1]} : vector<2x384xf32> to vector<2x128xf32>
    %53 = vector.extract_strided_slice %43 {offsets = [0, 128], sizes = [2, 128], strides = [1, 1]} : vector<2x384xf32> to vector<2x128xf32>
    %54 = arith.addf %52, %53 : vector<2x128xf32>
    %55 = arith.negf %54 : vector<2x128xf32>
    %56 = math.exp %55 : vector<2x128xf32>
    %cst_16 = arith.constant 1.000000e+00 : f32
    %57 = vector.broadcast %cst_16 : f32 to vector<2x128xf32>
    %58 = arith.addf %57, %56 : vector<2x128xf32>
    %59 = arith.divf %57, %58 : vector<2x128xf32>
    %60 = vector.extract_strided_slice %42 {offsets = [0, 256], sizes = [2, 128], strides = [1, 1]} : vector<2x384xf32> to vector<2x128xf32>
    %61 = vector.extract_strided_slice %43 {offsets = [0, 256], sizes = [2, 128], strides = [1, 1]} : vector<2x384xf32> to vector<2x128xf32>
    %62 = arith.addf %61, %3 : vector<2x128xf32>
    %63 = arith.mulf %51, %62 : vector<2x128xf32>
    %64 = arith.addf %60, %63 : vector<2x128xf32>
    %65 = math.tanh %64 : vector<2x128xf32>
    %66 = arith.subf %40, %65 : vector<2x128xf32>
    %67 = arith.mulf %59, %66 : vector<2x128xf32>
    %68 = arith.addf %65, %67 : vector<2x128xf32>
    %69 = vector.extract_strided_slice %11 {offsets = [0, 2, 0], sizes = [2, 1, 384], strides = [1, 1, 1]} : vector<2x8x384xf32> to vector<2x1x384xf32>
    %70 = vector.shape_cast %69 : vector<2x1x384xf32> to vector<2x384xf32>
    %cst_17 = arith.constant dense<0.000000e+00> : vector<2x384xf32>
    %71 = tpu.matmul %68, %0, %cst_17 {dimension_numbers = #tpu.dot_dimension_numbers<[1], [0], [0], [1], [0, 0, 1, 1], [], []>} : vector<2x128xf32>, vector<128x384xf32>, vector<2x384xf32> -> vector<2x384xf32>
    %72 = vector.extract_strided_slice %70 {offsets = [0, 0], sizes = [2, 128], strides = [1, 1]} : vector<2x384xf32> to vector<2x128xf32>
    %73 = vector.extract_strided_slice %71 {offsets = [0, 0], sizes = [2, 128], strides = [1, 1]} : vector<2x384xf32> to vector<2x128xf32>
    %74 = arith.addf %72, %73 : vector<2x128xf32>
    %75 = arith.negf %74 : vector<2x128xf32>
    %76 = math.exp %75 : vector<2x128xf32>
    %cst_18 = arith.constant 1.000000e+00 : f32
    %77 = vector.broadcast %cst_18 : f32 to vector<2x128xf32>
    %78 = arith.addf %77, %76 : vector<2x128xf32>
    %79 = arith.divf %77, %78 : vector<2x128xf32>
    %80 = vector.extract_strided_slice %70 {offsets = [0, 128], sizes = [2, 128], strides = [1, 1]} : vector<2x384xf32> to vector<2x128xf32>
    %81 = vector.extract_strided_slice %71 {offsets = [0, 128], sizes = [2, 128], strides = [1, 1]} : vector<2x384xf32> to vector<2x128xf32>
    %82 = arith.addf %80, %81 : vector<2x128xf32>
    %83 = arith.negf %82 : vector<2x128xf32>
    %84 = math.exp %83 : vector<2x128xf32>
    %cst_19 = arith.constant 1.000000e+00 : f32
    %85 = vector.broadcast %cst_19 : f32 to vector<2x128xf32>
    %86 = arith.addf %85, %84 : vector<2x128xf32>
    %87 = arith.divf %85, %86 : vector<2x128xf32>
    %88 = vector.extract_strided_slice %70 {offsets = [0, 256], sizes = [2, 128], strides = [1, 1]} : vector<2x384xf32> to vector<2x128xf32>
    %89 = vector.extract_strided_slice %71 {offsets = [0, 256], sizes = [2, 128], strides = [1, 1]} : vector<2x384xf32> to vector<2x128xf32>
    %90 = arith.addf %89, %3 : vector<2x128xf32>
    %91 = arith.mulf %79, %90 : vector<2x128xf32>
    %92 = arith.addf %88, %91 : vector<2x128xf32>
    %93 = math.tanh %92 : vector<2x128xf32>
    %94 = arith.subf %68, %93 : vector<2x128xf32>
    %95 = arith.mulf %87, %94 : vector<2x128xf32>
    %96 = arith.addf %93, %95 : vector<2x128xf32>
    %97 = vector.extract_strided_slice %11 {offsets = [0, 3, 0], sizes = [2, 1, 384], strides = [1, 1, 1]} : vector<2x8x384xf32> to vector<2x1x384xf32>
    %98 = vector.shape_cast %97 : vector<2x1x384xf32> to vector<2x384xf32>
    %cst_20 = arith.constant dense<0.000000e+00> : vector<2x384xf32>
    %99 = tpu.matmul %96, %0, %cst_20 {dimension_numbers = #tpu.dot_dimension_numbers<[1], [0], [0], [1], [0, 0, 1, 1], [], []>} : vector<2x128xf32>, vector<128x384xf32>, vector<2x384xf32> -> vector<2x384xf32>
    %100 = vector.extract_strided_slice %98 {offsets = [0, 0], sizes = [2, 128], strides = [1, 1]} : vector<2x384xf32> to vector<2x128xf32>
    %101 = vector.extract_strided_slice %99 {offsets = [0, 0], sizes = [2, 128], strides = [1, 1]} : vector<2x384xf32> to vector<2x128xf32>
    %102 = arith.addf %100, %101 : vector<2x128xf32>
    %103 = arith.negf %102 : vector<2x128xf32>
    %104 = math.exp %103 : vector<2x128xf32>
    %cst_21 = arith.constant 1.000000e+00 : f32
    %105 = vector.broadcast %cst_21 : f32 to vector<2x128xf32>
    %106 = arith.addf %105, %104 : vector<2x128xf32>
    %107 = arith.divf %105, %106 : vector<2x128xf32>
    %108 = vector.extract_strided_slice %98 {offsets = [0, 128], sizes = [2, 128], strides = [1, 1]} : vector<2x384xf32> to vector<2x128xf32>
    %109 = vector.extract_strided_slice %99 {offsets = [0, 128], sizes = [2, 128], strides = [1, 1]} : vector<2x384xf32> to vector<2x128xf32>
    %110 = arith.addf %108, %109 : vector<2x128xf32>
    %111 = arith.negf %110 : vector<2x128xf32>
    %112 = math.exp %111 : vector<2x128xf32>
    %cst_22 = arith.constant 1.000000e+00 : f32
    %113 = vector.broadcast %cst_22 : f32 to vector<2x128xf32>
    %114 = arith.addf %113, %112 : vector<2x128xf32>
    %115 = arith.divf %113, %114 : vector<2x128xf32>
    %116 = vector.extract_strided_slice %98 {offsets = [0, 256], sizes = [2, 128], strides = [1, 1]} : vector<2x384xf32> to vector<2x128xf32>
    %117 = vector.extract_strided_slice %99 {offsets = [0, 256], sizes = [2, 128], strides = [1, 1]} : vector<2x384xf32> to vector<2x128xf32>
    %118 = arith.addf %117, %3 : vector<2x128xf32>
    %119 = arith.mulf %107, %118 : vector<2x128xf32>
    %120 = arith.addf %116, %119 : vector<2x128xf32>
    %121 = math.tanh %120 : vector<2x128xf32>
    %122 = arith.subf %96, %121 : vector<2x128xf32>
    %123 = arith.mulf %115, %122 : vector<2x128xf32>
    %124 = arith.addf %121, %123 : vector<2x128xf32>
    %125 = vector.extract_strided_slice %11 {offsets = [0, 4, 0], sizes = [2, 1, 384], strides = [1, 1, 1]} : vector<2x8x384xf32> to vector<2x1x384xf32>
    %126 = vector.shape_cast %125 : vector<2x1x384xf32> to vector<2x384xf32>
    %cst_23 = arith.constant dense<0.000000e+00> : vector<2x384xf32>
    %127 = tpu.matmul %124, %0, %cst_23 {dimension_numbers = #tpu.dot_dimension_numbers<[1], [0], [0], [1], [0, 0, 1, 1], [], []>} : vector<2x128xf32>, vector<128x384xf32>, vector<2x384xf32> -> vector<2x384xf32>
    %128 = vector.extract_strided_slice %126 {offsets = [0, 0], sizes = [2, 128], strides = [1, 1]} : vector<2x384xf32> to vector<2x128xf32>
    %129 = vector.extract_strided_slice %127 {offsets = [0, 0], sizes = [2, 128], strides = [1, 1]} : vector<2x384xf32> to vector<2x128xf32>
    %130 = arith.addf %128, %129 : vector<2x128xf32>
    %131 = arith.negf %130 : vector<2x128xf32>
    %132 = math.exp %131 : vector<2x128xf32>
    %cst_24 = arith.constant 1.000000e+00 : f32
    %133 = vector.broadcast %cst_24 : f32 to vector<2x128xf32>
    %134 = arith.addf %133, %132 : vector<2x128xf32>
    %135 = arith.divf %133, %134 : vector<2x128xf32>
    %136 = vector.extract_strided_slice %126 {offsets = [0, 128], sizes = [2, 128], strides = [1, 1]} : vector<2x384xf32> to vector<2x128xf32>
    %137 = vector.extract_strided_slice %127 {offsets = [0, 128], sizes = [2, 128], strides = [1, 1]} : vector<2x384xf32> to vector<2x128xf32>
    %138 = arith.addf %136, %137 : vector<2x128xf32>
    %139 = arith.negf %138 : vector<2x128xf32>
    %140 = math.exp %139 : vector<2x128xf32>
    %cst_25 = arith.constant 1.000000e+00 : f32
    %141 = vector.broadcast %cst_25 : f32 to vector<2x128xf32>
    %142 = arith.addf %141, %140 : vector<2x128xf32>
    %143 = arith.divf %141, %142 : vector<2x128xf32>
    %144 = vector.extract_strided_slice %126 {offsets = [0, 256], sizes = [2, 128], strides = [1, 1]} : vector<2x384xf32> to vector<2x128xf32>
    %145 = vector.extract_strided_slice %127 {offsets = [0, 256], sizes = [2, 128], strides = [1, 1]} : vector<2x384xf32> to vector<2x128xf32>
    %146 = arith.addf %145, %3 : vector<2x128xf32>
    %147 = arith.mulf %135, %146 : vector<2x128xf32>
    %148 = arith.addf %144, %147 : vector<2x128xf32>
    %149 = math.tanh %148 : vector<2x128xf32>
    %150 = arith.subf %124, %149 : vector<2x128xf32>
    %151 = arith.mulf %143, %150 : vector<2x128xf32>
    %152 = arith.addf %149, %151 : vector<2x128xf32>
    %153 = vector.extract_strided_slice %11 {offsets = [0, 5, 0], sizes = [2, 1, 384], strides = [1, 1, 1]} : vector<2x8x384xf32> to vector<2x1x384xf32>
    %154 = vector.shape_cast %153 : vector<2x1x384xf32> to vector<2x384xf32>
    %cst_26 = arith.constant dense<0.000000e+00> : vector<2x384xf32>
    %155 = tpu.matmul %152, %0, %cst_26 {dimension_numbers = #tpu.dot_dimension_numbers<[1], [0], [0], [1], [0, 0, 1, 1], [], []>} : vector<2x128xf32>, vector<128x384xf32>, vector<2x384xf32> -> vector<2x384xf32>
    %156 = vector.extract_strided_slice %154 {offsets = [0, 0], sizes = [2, 128], strides = [1, 1]} : vector<2x384xf32> to vector<2x128xf32>
    %157 = vector.extract_strided_slice %155 {offsets = [0, 0], sizes = [2, 128], strides = [1, 1]} : vector<2x384xf32> to vector<2x128xf32>
    %158 = arith.addf %156, %157 : vector<2x128xf32>
    %159 = arith.negf %158 : vector<2x128xf32>
    %160 = math.exp %159 : vector<2x128xf32>
    %cst_27 = arith.constant 1.000000e+00 : f32
    %161 = vector.broadcast %cst_27 : f32 to vector<2x128xf32>
    %162 = arith.addf %161, %160 : vector<2x128xf32>
    %163 = arith.divf %161, %162 : vector<2x128xf32>
    %164 = vector.extract_strided_slice %154 {offsets = [0, 128], sizes = [2, 128], strides = [1, 1]} : vector<2x384xf32> to vector<2x128xf32>
    %165 = vector.extract_strided_slice %155 {offsets = [0, 128], sizes = [2, 128], strides = [1, 1]} : vector<2x384xf32> to vector<2x128xf32>
    %166 = arith.addf %164, %165 : vector<2x128xf32>
    %167 = arith.negf %166 : vector<2x128xf32>
    %168 = math.exp %167 : vector<2x128xf32>
    %cst_28 = arith.constant 1.000000e+00 : f32
    %169 = vector.broadcast %cst_28 : f32 to vector<2x128xf32>
    %170 = arith.addf %169, %168 : vector<2x128xf32>
    %171 = arith.divf %169, %170 : vector<2x128xf32>
    %172 = vector.extract_strided_slice %154 {offsets = [0, 256], sizes = [2, 128], strides = [1, 1]} : vector<2x384xf32> to vector<2x128xf32>
    %173 = vector.extract_strided_slice %155 {offsets = [0, 256], sizes = [2, 128], strides = [1, 1]} : vector<2x384xf32> to vector<2x128xf32>
    %174 = arith.addf %173, %3 : vector<2x128xf32>
    %175 = arith.mulf %163, %174 : vector<2x128xf32>
    %176 = arith.addf %172, %175 : vector<2x128xf32>
    %177 = math.tanh %176 : vector<2x128xf32>
    %178 = arith.subf %152, %177 : vector<2x128xf32>
    %179 = arith.mulf %171, %178 : vector<2x128xf32>
    %180 = arith.addf %177, %179 : vector<2x128xf32>
    %181 = vector.extract_strided_slice %11 {offsets = [0, 6, 0], sizes = [2, 1, 384], strides = [1, 1, 1]} : vector<2x8x384xf32> to vector<2x1x384xf32>
    %182 = vector.shape_cast %181 : vector<2x1x384xf32> to vector<2x384xf32>
    %cst_29 = arith.constant dense<0.000000e+00> : vector<2x384xf32>
    %183 = tpu.matmul %180, %0, %cst_29 {dimension_numbers = #tpu.dot_dimension_numbers<[1], [0], [0], [1], [0, 0, 1, 1], [], []>} : vector<2x128xf32>, vector<128x384xf32>, vector<2x384xf32> -> vector<2x384xf32>
    %184 = vector.extract_strided_slice %182 {offsets = [0, 0], sizes = [2, 128], strides = [1, 1]} : vector<2x384xf32> to vector<2x128xf32>
    %185 = vector.extract_strided_slice %183 {offsets = [0, 0], sizes = [2, 128], strides = [1, 1]} : vector<2x384xf32> to vector<2x128xf32>
    %186 = arith.addf %184, %185 : vector<2x128xf32>
    %187 = arith.negf %186 : vector<2x128xf32>
    %188 = math.exp %187 : vector<2x128xf32>
    %cst_30 = arith.constant 1.000000e+00 : f32
    %189 = vector.broadcast %cst_30 : f32 to vector<2x128xf32>
    %190 = arith.addf %189, %188 : vector<2x128xf32>
    %191 = arith.divf %189, %190 : vector<2x128xf32>
    %192 = vector.extract_strided_slice %182 {offsets = [0, 128], sizes = [2, 128], strides = [1, 1]} : vector<2x384xf32> to vector<2x128xf32>
    %193 = vector.extract_strided_slice %183 {offsets = [0, 128], sizes = [2, 128], strides = [1, 1]} : vector<2x384xf32> to vector<2x128xf32>
    %194 = arith.addf %192, %193 : vector<2x128xf32>
    %195 = arith.negf %194 : vector<2x128xf32>
    %196 = math.exp %195 : vector<2x128xf32>
    %cst_31 = arith.constant 1.000000e+00 : f32
    %197 = vector.broadcast %cst_31 : f32 to vector<2x128xf32>
    %198 = arith.addf %197, %196 : vector<2x128xf32>
    %199 = arith.divf %197, %198 : vector<2x128xf32>
    %200 = vector.extract_strided_slice %182 {offsets = [0, 256], sizes = [2, 128], strides = [1, 1]} : vector<2x384xf32> to vector<2x128xf32>
    %201 = vector.extract_strided_slice %183 {offsets = [0, 256], sizes = [2, 128], strides = [1, 1]} : vector<2x384xf32> to vector<2x128xf32>
    %202 = arith.addf %201, %3 : vector<2x128xf32>
    %203 = arith.mulf %191, %202 : vector<2x128xf32>
    %204 = arith.addf %200, %203 : vector<2x128xf32>
    %205 = math.tanh %204 : vector<2x128xf32>
    %206 = arith.subf %180, %205 : vector<2x128xf32>
    %207 = arith.mulf %199, %206 : vector<2x128xf32>
    %208 = arith.addf %205, %207 : vector<2x128xf32>
    %209 = vector.extract_strided_slice %11 {offsets = [0, 7, 0], sizes = [2, 1, 384], strides = [1, 1, 1]} : vector<2x8x384xf32> to vector<2x1x384xf32>
    %210 = vector.shape_cast %209 : vector<2x1x384xf32> to vector<2x384xf32>
    %cst_32 = arith.constant dense<0.000000e+00> : vector<2x384xf32>
    %211 = tpu.matmul %208, %0, %cst_32 {dimension_numbers = #tpu.dot_dimension_numbers<[1], [0], [0], [1], [0, 0, 1, 1], [], []>} : vector<2x128xf32>, vector<128x384xf32>, vector<2x384xf32> -> vector<2x384xf32>
    %212 = vector.extract_strided_slice %210 {offsets = [0, 0], sizes = [2, 128], strides = [1, 1]} : vector<2x384xf32> to vector<2x128xf32>
    %213 = vector.extract_strided_slice %211 {offsets = [0, 0], sizes = [2, 128], strides = [1, 1]} : vector<2x384xf32> to vector<2x128xf32>
    %214 = arith.addf %212, %213 : vector<2x128xf32>
    %215 = arith.negf %214 : vector<2x128xf32>
    %216 = math.exp %215 : vector<2x128xf32>
    %cst_33 = arith.constant 1.000000e+00 : f32
    %217 = vector.broadcast %cst_33 : f32 to vector<2x128xf32>
    %218 = arith.addf %217, %216 : vector<2x128xf32>
    %219 = arith.divf %217, %218 : vector<2x128xf32>
    %220 = vector.extract_strided_slice %210 {offsets = [0, 128], sizes = [2, 128], strides = [1, 1]} : vector<2x384xf32> to vector<2x128xf32>
    %221 = vector.extract_strided_slice %211 {offsets = [0, 128], sizes = [2, 128], strides = [1, 1]} : vector<2x384xf32> to vector<2x128xf32>
    %222 = arith.addf %220, %221 : vector<2x128xf32>
    %223 = arith.negf %222 : vector<2x128xf32>
    %224 = math.exp %223 : vector<2x128xf32>
    %cst_34 = arith.constant 1.000000e+00 : f32
    %225 = vector.broadcast %cst_34 : f32 to vector<2x128xf32>
    %226 = arith.addf %225, %224 : vector<2x128xf32>
    %227 = arith.divf %225, %226 : vector<2x128xf32>
    %228 = vector.extract_strided_slice %210 {offsets = [0, 256], sizes = [2, 128], strides = [1, 1]} : vector<2x384xf32> to vector<2x128xf32>
    %229 = vector.extract_strided_slice %211 {offsets = [0, 256], sizes = [2, 128], strides = [1, 1]} : vector<2x384xf32> to vector<2x128xf32>
    %230 = arith.addf %229, %3 : vector<2x128xf32>
    %231 = arith.mulf %219, %230 : vector<2x128xf32>
    %232 = arith.addf %228, %231 : vector<2x128xf32>
    %233 = math.tanh %232 : vector<2x128xf32>
    %234 = arith.subf %208, %233 : vector<2x128xf32>
    %235 = arith.mulf %227, %234 : vector<2x128xf32>
    %236 = arith.addf %233, %235 : vector<2x128xf32>
    %c0_35 = arith.constant 0 : index
    %c0_36 = arith.constant 0 : index
    %237 = vector.load %arg5[%c0_35, %c0_36] : memref<128x3xf32, #tpu.memory_space<vmem>>, vector<128x3xf32>
    %cst_37 = arith.constant dense<0.000000e+00> : vector<2x3xf32>
    %238 = tpu.matmul %236, %237, %cst_37 {dimension_numbers = #tpu.dot_dimension_numbers<[1], [0], [0], [1], [0, 0, 1, 1], [], []>} : vector<2x128xf32>, vector<128x3xf32>, vector<2x3xf32> -> vector<2x3xf32>
    %c0_38 = arith.constant 0 : index
    %c0_39 = arith.constant 0 : index
    %239 = vector.load %arg6[%c0_38, %c0_39] : memref<1x3xf32, #tpu.memory_space<vmem>>, vector<1x3xf32>
    %240 = vector.broadcast %239 : vector<1x3xf32> to vector<2x3xf32>
    %241 = arith.addf %238, %240 : vector<2x3xf32>
    %c0_40 = arith.constant 0 : index
    %c0_41 = arith.constant 0 : index
    %242 = vector.load %arg7[%c0_40, %c0_41] : memref<2x3xf32, #tpu.memory_space<vmem>>, vector<2x3xf32>
    tpu.vector_store %arg7[%c0_40, %c0_41], %241 {strides = array<i32>} : memref<2x3xf32, #tpu.memory_space<vmem>>, vector<2x3xf32>,
    return
  }
}

</mosaic_0001>

<bundles_post_ra>
// kernel: forward.1
= control target key start
LH: loop header
LB: loop body
LE: loop exit
PB: predicated region body
PF: predicated region fallthrough
CT: control target
= control target key end

     0   :  { %12 = vsyncpa [#allocation3], 0  ;;  %s3932_s0 = inlined_call_operand.vmem [shape: f32[2,8,4], index: 0, kind: input, shape index: {}]   ;;  %s3933_s1 = inlined_call_operand.vmem [shape: f32[4,384], index: 1, kind: input, shape index: {}]   ;;  %s3934_s2 = inlined_call_operand.hbm [shape: f32[128,384], index: 2, kind: input, shape index: {}]   ;;  %s3935_s3 = inlined_call_operand.vmem [shape: f32[1,384], index: 3, kind: input, shape index: {}]   ;;  %s3936_s4 = inlined_call_operand.vmem [shape: f32[1,128], index: 4, kind: input, shape index: {}]   ;;  %s3937_s5 = inlined_call_operand.vmem [shape: f32[128,3], index: 5, kind: input, shape index: {}]   ;;  %s3938_s6 = inlined_call_operand.vmem [shape: f32[1,3], index: 6, kind: input, shape index: {}]   ;;  %s3939_s7 = inlined_call_operand.hbm [shape: f32[2,3], index: 7, kind: output, shape index: {}]  }
   0x1   :  { %13 = vsyncpa [#allocation4], 0  ;;  %s3303_s24 = smov [#allocation2]   ;;  %s3255_s28 = scalar_lea.hbm %s3934_s2, 6144 }
   0x2   :  { %s23_s25 = sshll.u32 %s3303_s24, 4  ;;  %p3256_p0 = scmp.ne.s32.totalorder %s3934_s2, %s3255_s28  ;;  %s24_s25 = int_to_ptr.vmem [resolvable:$true] %s23_s25 }
   0x3   :  { %p3259_p1 = scmp.lt.u32.totalorder %s3255_s28, %s3934_s2 }
   0x5   :  { %p3261_p2 = pnand %p3259_p1, %p3256_p0 }
   0x7   :  { %3264 = shalt.err (!%p3261_p2)
}
   0x8   :  { %s3265_s10 = scalar_lea.vmem %s24_s25, 6144  ;;  %p3270_p4 = scmp.lt.s32.totalorder %s24_s25, %s24_s25 }
   0x9   :  { %p3266_p3 = scmp.ne.s32.totalorder %s24_s25, %s3265_s10  ;;  %p3271_p5 = scmp.lt.s32.totalorder %s3265_s10, %s3265_s10 }
   0xb   :  { %p3272_p6 = por %p3271_p5, %p3270_p4 }
   0xd   :  { %p3273_p7 = pnand %p3272_p6, %p3266_p3 }
   0xf   :  { %3276 = shalt.err (!%p3273_p7)
}
  0x10   :  { %s3304_s11 = smov 384   ;;  %s3305_s12 = smov 24  }
  0x11   :  { %29 = dma.hbm_to_vmem [thread:$0]  %s3934_s2, 6144, %s24_s25, [#allocation3], %s3304_s11, %s3304_s11, %s3305_s12  }
  0x12   :  { %3299 = dma.done.wait [#allocation3], 6144  }
  0x13   :  { %3300 = vsyncadd [#allocation3], 4294961152  ;;  %v3306_v0 = vmov 0.0   ;;  %v42_v1 = vld [vmem:[#allocation2 + $0x8] sm:$0xff]  ;;  %v45_v2 = vld [vmem:[#allocation2 + $0x20] sm:$0xff]  ;;  %vm127_vm0 = vcmask 1043456  }
  0x14   :  { %198 = vmatprep.mubr.f32.mxu1 %v3306_v0  ;;  %350 = vmatprep.mubr.f32.mxu0 %v3306_v0  ;;  %v41_v3 = vld [vmem:[#allocation2] sm:$0xff]  ;;  %v3364_v4 = vpack.c.bf16 %v45_v2, %v42_v1  ;;  %v44_v5 = vld [vmem:[#allocation2 + $0x18] sm:$0xff]  ;;  %v51_v7 = vld [vmem:[#allocation2 + $0x50] sm:$0xff]  ;;  %vm120_vm1 = vcmask 31744   ;;  %v3307_v32 = vmov 0.0|0.0   ;;  %vm3308_vm2 = vmmov 0  }
  0x15   :  { %v48_v6 = vld [vmem:[#allocation2 + $0x38] sm:$0xff]  ;;  %v3366_v8 = vpack.c.bf16 %v44_v5, %v41_v3  ;;  %v47_v10 = vld [vmem:[#allocation2 + $0x30] sm:$0xff]  ;;  %v50_v11 = vld [vmem:[#allocation2 + $0x48] sm:$0xff]  ;;  %vm483_vm3 = vcmask 1041409   ;;  %s3309_s29 = smov [#allocation5]   ;;  %vm2080_vm4 = vcmask 17408  }
  0x16   :  { %v3368_v9 = vpack.c.bf16 %v51_v7, %v48_v6  ;;  %v54_v12 = vld [vmem:[#allocation2 + $0x68] sm:$0xff]  ;;  %2615 = vmatprep.subr.bf16.mxu0 %v3364_v4  ;;  %v57_v13 = vld [vmem:[#allocation2 + $0x80] sm:$0xff]  ;;  %v3372_v14 = vpack.c.bf16 %v50_v11, %v47_v10  ;;  %v56_v17 = vld [vmem:[#allocation2 + $0x78] sm:$0xff]  ;;  %s2088_s30 = sshll.u32 %s3309_s29, 4  ;;  %s2089_s30 = int_to_ptr.vmem [resolvable:$true] %s2088_s30 }
  0x17   :  { %2617 = vmatpush1.bf16.msra.mxu0 %v3366_v8  ;;  %v3375_v15 = vpack.c.bf16 %v57_v13, %v54_v12  ;;  %v53_v16 = vld [vmem:[#allocation2 + $0x60] sm:$0xff]  ;;  %v98_v18 = vld [vmem:[%s3933_s1] sm:$0xff]  ;;  %v60_v19 = vld [vmem:[#allocation2 + $0x98] sm:$0xff]  ;;  %s3277_s8 = scalar_lea.vmem %s2089_s30, 32  ;;  %p3282_p9 = scmp.lt.s32.totalorder %s2089_s30, %s2089_s30 }
  0x18   :  { %2619 = vmatprep.subr.bf16.mxu0 %v3368_v9  ;;  %v63_v20 = vld [vmem:[#allocation2 + $0xb0] sm:$0xff]  ;;  %v119_v21 = vcombine.high %v98_v18, %v98_v18  ;;  %v99_v23 = vld [vmem:[%s3933_s1 + $0x8] sm:$0xf]  ;;  %v3387_v24 = vpack.c.bf16 %v56_v17, %v53_v16  ;;  %v62_v27 = vld [vmem:[#allocation2 + $0xa8] sm:$0xff]  ;;  %p3278_p8 = scmp.ne.s32.totalorder %s2089_s30, %s3277_s8  ;;  %p3283_p10 = scmp.lt.s32.totalorder %s3277_s8, %s3277_s8 }
  0x19   :  { %v96_v22 = vld [vmem:[%s3932_s0] sm:$0xff]  ;;  %v3391_v25 = vpack.c.bf16 %v63_v20, %v60_v19  ;;  %v66_v28 = vld [vmem:[#allocation2 + $0xc8] sm:$0xff]  ;;  %v69_v29 = vld [vmem:[#allocation2 + $0xe0] sm:$0xff] }
  0x1a   :  { %2098 = vmatprep.subr.msk.mxu1 %vm127_vm0, %v119_v21  ;;  %v59_v26 = vld [vmem:[#allocation2 + $0x90] sm:$0xff]  ;;  %v97_v30 = vld [vmem:[%s3932_s0 + $0x8] sm:$0xff]  ;;  %v46_v34 = vld [vmem:[#allocation2 + $0x28] sm:$0xff]  ;;  %v3406_v35 = vpack.c.bf16 %v69_v29, %v66_v28  ;;  %p3284_p11 = por %p3283_p10, %p3282_p9 }
  0x1b   :  { %2621 = vmatpush1.bf16.msra.mxu0 %v3372_v14  ;;  %2099 = vmatpush1.msk.msra.mxu1 %vm127_vm0, %v98_v18  ;;  %v3402_v31 = vpack.c.bf16 %v62_v27, %v59_v26  ;;  %v43_v33 = vld [vmem:[#allocation2 + $0x10] sm:$0xff]  ;;  %v65_v36 = vld [vmem:[#allocation2 + $0xc0] sm:$0xff]  ;;  %v68_v37 = vld [vmem:[#allocation2 + $0xd8] sm:$0xff]  ;;  %v102_v27 = vlaneseq }
  0x1c   :  { %2623 = vmatprep.subr.bf16.mxu0 %v3375_v15  ;;  %2100 = vmatmul.mubr.msk.f32.vlgmr.msra.gmra.mrb[0].mxu1 %vm120_vm1, %v96_v22  ;;  %v72_v38 = vld [vmem:[#allocation2 + $0xf8] sm:$0xff]  ;;  %v75_v39 = vld [vmem:[#allocation2 + $0x110] sm:$0xff]  ;;  %v3410_v40 = vpack.c.bf16 %v46_v34, %v43_v33  ;;  %v3413_v41 = vpack.c.bf16 %v68_v37, %v65_v36  ;;  %v49_v42 = vld [vmem:[#allocation2 + $0x40] sm:$0xff]  ;;  %p3285_p12 = pnand %p3284_p11, %p3278_p8 }
  0x1d   :  { %2294 = vmatprep.subr.msk.mxu1 %vm127_vm0, %v99_v23  ;;  %204 = vmatprep.mubr.f32.mxu1 %v3306_v0  ;;  %v52_v43 = vld [vmem:[#allocation2 + $0x58] sm:$0xff]  ;;  %v3416_v44 = vpack.c.bf16 %v75_v39, %v72_v38  ;;  %v71_v45 = vld [vmem:[#allocation2 + $0xf0] sm:$0xff]  ;;  %v74_v46 = vld [vmem:[#allocation2 + $0x108] sm:$0xff] }
  0x1e   :  { %2295 = vmatpush3.msk.msra.mxu1 %vm127_vm0, %v99_v23  ;;  %v78_v47 = vld [vmem:[#allocation2 + $0x128] sm:$0xff]  ;;  %v81_v48 = vld [vmem:[#allocation2 + $0x140] sm:$0xff]  ;;  %v3420_v49 = vpack.c.bf16 %v52_v43, %v49_v42  ;;  %v3425_v50 = vpack.c.bf16 %v74_v46, %v71_v45  ;;  %v55_v51 = vld [vmem:[#allocation2 + $0x70] sm:$0xff] }
  0x1f   :  { %2625 = vmatpush1.bf16.msra.mxu0 %v3387_v24  ;;  %2646 = vmatprep.subr.bf16.mxu1 %v3307_v32  ;;  %v58_v52 = vld [vmem:[#allocation2 + $0x88] sm:$0xff]  ;;  %v3429_v53 = vpack.c.bf16 %v81_v48, %v78_v47  ;;  %v77_v54 = vld [vmem:[#allocation2 + $0x120] sm:$0xff]  ;;  %v80_v55 = vld [vmem:[#allocation2 + $0x138] sm:$0xff] }
  0x20   :  { %2627 = vmatprep.subr.bf16.mxu0 %v3391_v25  ;;  %2101 = vmatmul.mubr.msk.f32.gmra.mrb[2].mxu1 %vm120_vm1, %v97_v30  ;;  %v84_v56 = vld [vmem:[#allocation2 + $0x158] sm:$0xff]  ;;  %v87_v57 = vld [vmem:[#allocation2 + $0x170] sm:$0xff]  ;;  %v3432_v58 = vpack.c.bf16 %v58_v52, %v55_v51  ;;  %v3435_v59 = vpack.c.bf16 %v80_v55, %v77_v54  ;;  %v61_v60 = vld [vmem:[#allocation2 + $0xa0] sm:$0xff] }
  0x21   :  { %2296 = vmatprep.mubr.msk.f32.mxu1 %vm120_vm1, %v96_v22  ;;  %v64_v61 = vld [vmem:[#allocation2 + $0xb8] sm:$0xff]  ;;  %v3439_v62 = vpack.c.bf16 %v87_v57, %v84_v56  ;;  %v83_v63 = vld [vmem:[#allocation2 + $0x150] sm:$0xff]  ;;  %v86_v1 = vld [vmem:[#allocation2 + $0x168] sm:$0xff] }
  0x22   :  { %v3442_v2 = vpack.c.bf16 %v64_v61, %v61_v60  ;;  %v3445_v3 = vpack.c.bf16 %v86_v1, %v83_v63  ;;  %v67_v5 = vld [vmem:[#allocation2 + $0xd0] sm:$0xff]  ;;  %v70_v6 = vld [vmem:[#allocation2 + $0xe8] sm:$0xff]  ;;  %v73_v10 = vld [vmem:[#allocation2 + $0x100] sm:$0xff] }
  0x23   :  { %2629 = vmatpush1.bf16.msra.mxu0 %v3402_v31  ;;  %v3450_v7 = vpack.c.bf16 %v70_v6, %v67_v5  ;;  %v76_v11 = vld [vmem:[#allocation2 + $0x118] sm:$0xff]  ;;  %v79_v13 = vld [vmem:[#allocation2 + $0x130] sm:$0xff]  ;;  %v82_v16 = vld [vmem:[#allocation2 + $0x148] sm:$0xff] }
  0x24   :  { %2631 = vmatprep.subr.bf16.mxu0 %v3406_v35  ;;  %2297 = vmatmul.mubr.msk.f32.vlgmr.msra.gmra.mrb[4].mxu1 %vm120_vm1, %v97_v30  ;;  %v3457_v12 = vpack.c.bf16 %v76_v11, %v73_v10  ;;  %v3464_v17 = vpack.c.bf16 %v82_v16, %v79_v13  ;;  %v85_v18 = vld [vmem:[#allocation2 + $0x160] sm:$0xff]  ;;  %v88_v19 = vld [vmem:[#allocation2 + $0x178] sm:$0xff]  ;;  %v103_v30 = vshrl.u32 %v102_v27, 7  ;;  %v100_v34 = vld [vmem:[%s3935_s3] sm:$0x7] }
  0x25   :  { %2648 = vmatpush3.bf16.msra.mxu1 %v3410_v40  ;;  %2331 = vmatprep.mubr.msk.f32.mxu1 %vm3308_vm2, %v3306_v0  ;;  %v3470_v20 = vpack.c.bf16 %v88_v19, %v85_v18  ;;  %v3524_v16 = vld [vmem:[%s3936_s4] ss:$0 sm:$0xff] }
  0x26   :  { %2649 = vmatprep.subr.bf16.mxu1 %v3307_v32  ;;  %v104_v33 = vsub.s32 0, %v103_v30  ;;  %v108_v38 = vsub.s32 1, %v103_v30  ;;  %v112_v18 = vsub.s32 2, %v103_v30 }
  0x27   :  { %2633 = vmatpush1.bf16.msra.mxu0 %v3413_v41 }
  0x28   :  { %2635 = vmatprep.subr.bf16.mxu0 %v3416_v44  ;;  %v105_v36 = vrot.slane %v100_v34, %v104_v33  ;;  %v109_v47 = vrot.slane %v100_v34, %v108_v38 }
  0x29   :  { %2651 = vmatpush3.bf16.msra.mxu1 %v3420_v49 }
  0x2a   :  { %2652 = vmatprep.subr.bf16.mxu1 %v3307_v32 }
  0x2b   :  { %2637 = vmatpush1.bf16.msra.mxu0 %v3425_v50 }
  0x2c   :  { %2639 = vmatprep.subr.bf16.mxu0 %v3429_v53 }
  0x2d   :  { %2654 = vmatpush3.bf16.msra.mxu1 %v3432_v58 }
  0x2e   :  { %2655 = vmatprep.subr.bf16.mxu1 %v3307_v32 }
  0x2f   :  { %2641 = vmatpush1.bf16.msra.mxu0 %v3435_v59 }
  0x30   :  { %2643 = vmatprep.subr.bf16.mxu0 %v3439_v62 }
  0x31   :  { %2657 = vmatpush3.bf16.msra.mxu1 %v3442_v2 }
  0x32   :  { %2658 = vmatprep.subr.bf16.mxu1 %v3307_v32 }
  0x33   :  { %2645 = vmatpush1.bf16.msra.mxu0 %v3445_v3 }
  0x34   :  { %2671 = vmatprep.subr.bf16.mxu0 %v3364_v4 }
  0x35   :  { %2660 = vmatpush3.bf16.msra.mxu1 %v3450_v7 }
  0x36   :  { %351 = vmatmul.mubr.f32.vlgmr.msra.gmra.mrb[0].mxu0 %v3306_v0  ;;  %2661 = vmatprep.subr.bf16.mxu1 %v3307_v32 }
  0x37   :  { %2673 = vmatpush1.bf16.msra.mxu0 %v3366_v8  ;;  %550 = vmatprep.mubr.f32.mxu0 %v3306_v0 }
  0x38   :  { %2675 = vmatprep.subr.bf16.mxu0 %v3368_v9 }
  0x39   :  { %2663 = vmatpush3.bf16.msra.mxu1 %v3457_v12 }
  0x3a   :  { %2664 = vmatprep.subr.bf16.mxu1 %v3307_v32 }
  0x3b   :  { %2677 = vmatpush1.bf16.msra.mxu0 %v3372_v14 }
  0x3c   :  { %2679 = vmatprep.subr.bf16.mxu0 %v3375_v15 }
  0x3d   :  { %2666 = vmatpush3.bf16.msra.mxu1 %v3464_v17 }
  0x3e   :  { %2667 = vmatprep.subr.bf16.mxu1 %v3307_v32 }
  0x3f   :  { %2681 = vmatpush1.bf16.msra.mxu0 %v3387_v24 }
  0x40   :  { %2683 = vmatprep.subr.bf16.mxu0 %v3391_v25 }
  0x41   :  { %2669 = vmatpush3.bf16.msra.mxu1 %v3470_v20 }
  0x42   :  { %2702 = vmatprep.subr.bf16.mxu1 %v3307_v32 }
  0x43   :  { %2685 = vmatpush1.bf16.msra.mxu0 %v3402_v31 }
  0x44   :  { %2687 = vmatprep.subr.bf16.mxu0 %v3406_v35  ;;  %2332 = vmatmul.mubr.f32.vlgmr.msra.gmra.mrb[6].mxu1 %v3306_v0 }
  0x45   :  { %2704 = vmatpush3.bf16.msra.mxu1 %v3410_v40  ;;  %2366 = vmatprep.mubr.msk.f32.mxu1 %vm3308_vm2, %v3306_v0 }
  0x46   :  { %2705 = vmatprep.subr.bf16.mxu1 %v3307_v32 }
  0x47   :  { %2689 = vmatpush1.bf16.msra.mxu0 %v3413_v41 }
  0x48   :  { %2691 = vmatprep.subr.bf16.mxu0 %v3416_v44 }
  0x49   :  { %2707 = vmatpush3.bf16.msra.mxu1 %v3420_v49 }
  0x4a   :  { %2708 = vmatprep.subr.bf16.mxu1 %v3307_v32 }
  0x4b   :  { %2693 = vmatpush1.bf16.msra.mxu0 %v3425_v50 }
  0x4c   :  { %2695 = vmatprep.subr.bf16.mxu0 %v3429_v53 }
  0x4d   :  { %2710 = vmatpush3.bf16.msra.mxu1 %v3432_v58 }
  0x4e   :  { %2711 = vmatprep.subr.bf16.mxu1 %v3307_v32 }
  0x4f   :  { %2697 = vmatpush1.bf16.msra.mxu0 %v3435_v59 }
  0x50   :  { %2699 = vmatprep.subr.bf16.mxu0 %v3439_v62 }
  0x51   :  { %2713 = vmatpush3.bf16.msra.mxu1 %v3442_v2 }
  0x52   :  { %2714 = vmatprep.subr.bf16.mxu1 %v3307_v32 }
  0x53   :  { %2701 = vmatpush1.bf16.msra.mxu0 %v3445_v3 }
  0x54   :  { %2727 = vmatprep.subr.bf16.mxu0 %v3364_v4 }
  0x55   :  { %2716 = vmatpush3.bf16.msra.mxu1 %v3450_v7 }
  0x56   :  { %2717 = vmatprep.subr.bf16.mxu1 %v3307_v32 }
  0x59   :  { %2719 = vmatpush3.bf16.msra.mxu1 %v3457_v12 }
  0x5a   :  { %2720 = vmatprep.subr.bf16.mxu1 %v3307_v32 }
  0x5d   :  { %2722 = vmatpush3.bf16.msra.mxu1 %v3464_v17 }
  0x5e   :  { %2723 = vmatprep.subr.bf16.mxu1 %v3307_v32 }
  0x61   :  { %2725 = vmatpush3.bf16.msra.mxu1 %v3470_v20 }
  0x62   :  { %2758 = vmatprep.subr.bf16.mxu1 %v3307_v32 }
  0xef   :  { %v200_v21 = vpop.f32.mrb[0].mxu1 }
  0xf0   :  { %v202_v22 = vpop.f32.mrb[1].mxu1  ;;  %v3509_v37 = vadd.f32 %v200_v21, %v105_v36  ;;  %v113_v21 = vrot.slane %v100_v34, %v112_v18 }
  0xf1   :  { %v3515_v54 = vadd.f32 %v202_v22, %v109_v47 }
  0xf3   :  { %v206_v23 = vpop.f32.mrb[2].mxu1 }
  0xf4   :  { %v208_v26 = vpop.f32.mrb[3].mxu1  ;;  %v3511_v42 = vadd.f32 %v206_v23, %v105_v36 }
  0xf5   :  { %v3517_v56 = vadd.f32 %v208_v26, %v109_v47 }
  0xf7   :  { %v2298_v28 = vpop.f32.mrb[4].mxu1 }
  0xf8   :  { %v277_v29 = vpop.f32.mrb[5].mxu1 }
  0xf9   :  { %v3527_v33 = vadd.f32 %v277_v29, %v113_v21 }
 0x109   :  { %v352_v39 = vpop.f32.mrb[0].mxu0 }
 0x10a   :  { %v428_v43 = vrot.slane %v352_v39, 1  ;;  %v431_v45 = vadd.f32 %v352_v39, %v3509_v37  ;;  %v354_v46 = vpop.f32.mrb[1].mxu0 }
 0x10b   :  { %v446_v55 = vrot.slane %v354_v46, 1  ;;  %v449_v57 = vadd.f32 %v354_v46, %v3515_v54 }
 0x10c   :  { %v432_v48 = vadd.f32 %v428_v43, %v3511_v42  ;;  %v2105_v51 = vmul.f32 -1.442695, %v431_v45  ;;  %v3529_v43 = vadd.f32 %v2298_v28, %v113_v21 }
 0x10d   :  { %v450_v60 = vadd.f32 %v446_v55, %v3517_v56  ;;  %v2107_v61 = vmul.f32 -1.442695, %v449_v57 }
 0x10e   :  { %3094 = vpow2.f32 %v2105_v51  ;;  %v2106_v52 = vmul.f32 -1.442695, %v432_v48 }
 0x10f   :  { %v2108_v1 = vmul.f32 -1.442695, %v450_v60 }
 0x110   :  { %3096 = vpow2.f32 %v2106_v52 }
 0x111   :  { %3098 = vpow2.f32 %v2107_v61 }
 0x117   :  { %v423_v5 = vpop.f32.mrb[6].mxu1 }
 0x118   :  { %v3095_v63 = vpop.eup %3094  ;;  %v2333_v10 = vpop.f32.mrb[7].mxu1  ;;  %v463_v19 = vadd.f32 %v3524_v16, %v423_v5 }
 0x119   :  { %v439_v6 = vadd.f32 1.0, %v3095_v63 }
 0x11a   :  { %v3097_v11 = vpop.eup %3096  ;;  %v465_v23 = vrot.slane %v463_v19, 1 }
 0x11b   :  { %v440_v13 = vadd.f32 1.0, %v3097_v11  ;;  %3100 = vrcp.f32 %v439_v6  ;;  %v3099_v22 = vpop.eup %3098 }
 0x11c   :  { %3102 = vpow2.f32 %v2108_v1  ;;  %v457_v39 = vadd.f32 1.0, %v3099_v22 }
 0x11d   :  { %3104 = vrcp.f32 %v440_v13 }
 0x125   :  { %v3101_v26 = vpop.eup %3100 }
 0x126   :  { %v3103_v27 = vpop.eup %3102  ;;  %v468_v36 = vmul.f32 %v3101_v26, %v463_v19 }
 0x127   :  { %v3105_v38 = vpop.eup %3104  ;;  %v458_v47 = vadd.f32 1.0, %v3103_v27 }
 0x128   :  { %v469_v45 = vmul.f32 %v3105_v38, %v465_v23  ;;  %v470_v46 = vadd.f32 %v468_v36, %v3527_v33 }
 0x12a   :  { %v471_v30 = vadd.f32 %v469_v45, %v3529_v43  ;;  %3106 = vtanh.f32 %v470_v46 }
 0x12b   :  { %3108 = vrcp.f32 %v457_v39 }
 0x12c   :  { %3110 = vtanh.f32 %v471_v30 }
 0x12d   :  { %3112 = vrcp.f32 %v458_v47 }
 0x134   :  { %v3107_v34 = vpop.eup %3106 }
 0x135   :  { %v3109_v48 = vpop.eup %3108  ;;  %v474_v51 = vsub.f32 0.0, %v3107_v34 }
 0x136   :  { %v3111_v29 = vpop.eup %3110 }
 0x137   :  { %v475_v52 = vsub.f32 0.0, %v3111_v29  ;;  %v476_v55 = vmul.f32 %v3109_v48, %v474_v51  ;;  %v3113_v57 = vpop.eup %3112 }
 0x139   :  { %v477_v60 = vmul.f32 %v3113_v57, %v475_v52  ;;  %v3533_v28 = vadd.f32 %v3107_v34, %v476_v55 }
 0x13b   :  { %v3535_v61 = vadd.f32 %v3111_v29, %v477_v60 }
 0x13d   :  { %v482_v63 = vrot.slane %v3535_v61, 7 }
 0x13f   :  { %v484_v1 = vsel %vm483_vm3, %v482_v63, %v3533_v28 }
 0x140   :  { %551 = vmatmul.mubr.f32.vlgmr.msra.gmra.mrb[2].mxu0 %v484_v1  ;;  %2367 = vmatmul.mubr.f32.vlgmr.msra.gmra.mrb[8].mxu1 %v484_v1 }
 0x141   :  { %2729 = vmatpush1.bf16.msra.mxu0 %v3366_v8  ;;  %2760 = vmatpush3.bf16.msra.mxu1 %v3410_v40 }
 0x142   :  { %2731 = vmatprep.subr.bf16.mxu0 %v3368_v9  ;;  %2761 = vmatprep.subr.bf16.mxu1 %v3307_v32 }
 0x143   :  { %761 = vmatprep.mubr.f32.mxu0 %v3306_v0  ;;  %2401 = vmatprep.mubr.msk.f32.mxu1 %vm3308_vm2, %v3306_v0 }
 0x145   :  { %2733 = vmatpush1.bf16.msra.mxu0 %v3372_v14  ;;  %2763 = vmatpush3.bf16.msra.mxu1 %v3420_v49 }
 0x146   :  { %2735 = vmatprep.subr.bf16.mxu0 %v3375_v15  ;;  %2764 = vmatprep.subr.bf16.mxu1 %v3307_v32 }
 0x149   :  { %2737 = vmatpush1.bf16.msra.mxu0 %v3387_v24  ;;  %2766 = vmatpush3.bf16.msra.mxu1 %v3432_v58 }
 0x14a   :  { %2739 = vmatprep.subr.bf16.mxu0 %v3391_v25  ;;  %2767 = vmatprep.subr.bf16.mxu1 %v3307_v32 }
 0x14d   :  { %2741 = vmatpush1.bf16.msra.mxu0 %v3402_v31  ;;  %2769 = vmatpush3.bf16.msra.mxu1 %v3442_v2 }
 0x14e   :  { %2743 = vmatprep.subr.bf16.mxu0 %v3406_v35  ;;  %2770 = vmatprep.subr.bf16.mxu1 %v3307_v32 }
 0x151   :  { %2745 = vmatpush1.bf16.msra.mxu0 %v3413_v41  ;;  %2772 = vmatpush3.bf16.msra.mxu1 %v3450_v7 }
 0x152   :  { %2747 = vmatprep.subr.bf16.mxu0 %v3416_v44  ;;  %2773 = vmatprep.subr.bf16.mxu1 %v3307_v32 }
 0x155   :  { %2749 = vmatpush1.bf16.msra.mxu0 %v3425_v50  ;;  %2775 = vmatpush3.bf16.msra.mxu1 %v3457_v12 }
 0x156   :  { %2751 = vmatprep.subr.bf16.mxu0 %v3429_v53  ;;  %2776 = vmatprep.subr.bf16.mxu1 %v3307_v32 }
 0x159   :  { %2753 = vmatpush1.bf16.msra.mxu0 %v3435_v59  ;;  %2778 = vmatpush3.bf16.msra.mxu1 %v3464_v17 }
 0x15a   :  { %2755 = vmatprep.subr.bf16.mxu0 %v3439_v62  ;;  %2779 = vmatprep.subr.bf16.mxu1 %v3307_v32 }
 0x15d   :  { %2757 = vmatpush1.bf16.msra.mxu0 %v3445_v3  ;;  %2781 = vmatpush3.bf16.msra.mxu1 %v3470_v20 }
 0x15e   :  { %2783 = vmatprep.subr.bf16.mxu0 %v3364_v4  ;;  %2814 = vmatprep.subr.bf16.mxu1 %v3307_v32 }
 0x213   :  { %v552_v5 = vpop.f32.mrb[2].mxu0  ;;  %v623_v6 = vpop.f32.mrb[8].mxu1 }
 0x214   :  { %v628_v10 = vrot.slane %v552_v5, 7  ;;  %v632_v11 = vadd.f32 %v552_v5, %v3511_v42  ;;  %v554_v13 = vpop.f32.mrb[3].mxu0  ;;  %v2368_v18 = vpop.f32.mrb[9].mxu1  ;;  %v663_v30 = vadd.f32 %v3524_v16, %v623_v6 }
 0x215   :  { %v646_v23 = vrot.slane %v554_v13, 7  ;;  %v650_v26 = vadd.f32 %v554_v13, %v3517_v56 }
 0x216   :  { %v631_v19 = vadd.f32 %v628_v10, %v3509_v37  ;;  %v2110_v21 = vmul.f32 -1.442695, %v632_v11  ;;  %v665_v48 = vrot.slane %v663_v30, 7 }
 0x217   :  { %v649_v38 = vadd.f32 %v646_v23, %v3515_v54  ;;  %v2112_v46 = vmul.f32 -1.442695, %v650_v26 }
 0x218   :  { %v2109_v22 = vmul.f32 -1.442695, %v631_v19  ;;  %3114 = vpow2.f32 %v2110_v21 }
 0x219   :  { %v2111_v47 = vmul.f32 -1.442695, %v649_v38 }
 0x21a   :  { %3116 = vpow2.f32 %v2109_v22 }
 0x222   :  { %v3115_v27 = vpop.eup %3114 }
 0x223   :  { %v640_v36 = vadd.f32 1.0, %v3115_v27 }
 0x224   :  { %v3117_v39 = vpop.eup %3116 }
 0x225   :  { %v639_v45 = vadd.f32 1.0, %v3117_v39  ;;  %3118 = vrcp.f32 %v640_v36 }
 0x227   :  { %3120 = vrcp.f32 %v639_v45 }
 0x228   :  { %3122 = vpow2.f32 %v2112_v46 }
 0x229   :  { %3124 = vpow2.f32 %v2111_v47 }
 0x22f   :  { %v3119_v34 = vpop.eup %3118 }
 0x230   :  { %v669_v51 = vmul.f32 %v3119_v34, %v663_v30 }
 0x231   :  { %v3121_v29 = vpop.eup %3120 }
 0x232   :  { %v668_v52 = vmul.f32 %v3121_v29, %v665_v48  ;;  %v671_v55 = vadd.f32 %v669_v51, %v3529_v43  ;;  %v3123_v57 = vpop.eup %3122 }
 0x233   :  { %v3125_v63 = vpop.eup %3124  ;;  %v658_v1 = vadd.f32 1.0, %v3123_v57 }
 0x234   :  { %v670_v60 = vadd.f32 %v668_v52, %v3527_v33  ;;  %3126 = vtanh.f32 %v671_v55  ;;  %v657_v5 = vadd.f32 1.0, %v3125_v63 }
 0x236   :  { %3128 = vtanh.f32 %v670_v60 }
 0x237   :  { %3130 = vrcp.f32 %v658_v1 }
 0x238   :  { %3132 = vrcp.f32 %v657_v5 }
 0x23e   :  { %v3127_v10 = vpop.eup %3126 }
 0x23f   :  { %v677_v11 = vrot.slane %v3127_v10, 1 }
 0x240   :  { %v3129_v6 = vpop.eup %3128 }
 0x241   :  { %v676_v13 = vrot.slane %v3129_v6, 1  ;;  %v681_v18 = vsub.f32 %v3535_v61, %v677_v11  ;;  %v3131_v22 = vpop.eup %3130 }
 0x242   :  { %v3133_v27 = vpop.eup %3132 }
 0x243   :  { %v680_v19 = vsub.f32 %v3533_v28, %v676_v13  ;;  %v685_v21 = vrot.slane %v681_v18, 7 }
 0x245   :  { %v684_v23 = vrot.slane %v680_v19, 7  ;;  %v689_v26 = vmul.f32 %v3131_v22, %v685_v21 }
 0x247   :  { %v688_v36 = vmul.f32 %v3133_v27, %v684_v23  ;;  %v3584_v38 = vadd.f32 %v3127_v10, %v689_v26 }
 0x249   :  { %v3586_v39 = vadd.f32 %v3129_v6, %v688_v36 }
 0x24b   :  { %v694_v45 = vrot.slane %v3586_v39, 1 }
 0x24d   :  { %v695_v46 = vsel %vm483_vm3, %v3584_v38, %v694_v45 }
 0x24e   :  { %762 = vmatmul.mubr.f32.vlgmr.msra.gmra.mrb[4].mxu0 %v695_v46  ;;  %2402 = vmatmul.mubr.f32.vlgmr.msra.gmra.mrb[10].mxu1 %v695_v46 }
 0x24f   :  { %2785 = vmatpush1.bf16.msra.mxu0 %v3366_v8  ;;  %2816 = vmatpush3.bf16.msra.mxu1 %v3410_v40 }
 0x250   :  { %2787 = vmatprep.subr.bf16.mxu0 %v3368_v9  ;;  %2817 = vmatprep.subr.bf16.mxu1 %v3307_v32 }
 0x251   :  { %976 = vmatprep.mubr.f32.mxu0 %v3306_v0  ;;  %2436 = vmatprep.mubr.msk.f32.mxu1 %vm3308_vm2, %v3306_v0 }
 0x253   :  { %2789 = vmatpush1.bf16.msra.mxu0 %v3372_v14  ;;  %2819 = vmatpush3.bf16.msra.mxu1 %v3420_v49 }
 0x254   :  { %2791 = vmatprep.subr.bf16.mxu0 %v3375_v15  ;;  %2820 = vmatprep.subr.bf16.mxu1 %v3307_v32 }
 0x257   :  { %2793 = vmatpush1.bf16.msra.mxu0 %v3387_v24  ;;  %2822 = vmatpush3.bf16.msra.mxu1 %v3432_v58 }
 0x258   :  { %2795 = vmatprep.subr.bf16.mxu0 %v3391_v25  ;;  %2823 = vmatprep.subr.bf16.mxu1 %v3307_v32 }
 0x25b   :  { %2797 = vmatpush1.bf16.msra.mxu0 %v3402_v31  ;;  %2825 = vmatpush3.bf16.msra.mxu1 %v3442_v2 }
 0x25c   :  { %2799 = vmatprep.subr.bf16.mxu0 %v3406_v35  ;;  %2826 = vmatprep.subr.bf16.mxu1 %v3307_v32 }
 0x25f   :  { %2801 = vmatpush1.bf16.msra.mxu0 %v3413_v41  ;;  %2828 = vmatpush3.bf16.msra.mxu1 %v3450_v7 }
 0x260   :  { %2803 = vmatprep.subr.bf16.mxu0 %v3416_v44  ;;  %2829 = vmatprep.subr.bf16.mxu1 %v3307_v32 }
 0x263   :  { %2805 = vmatpush1.bf16.msra.mxu0 %v3425_v50  ;;  %2831 = vmatpush3.bf16.msra.mxu1 %v3457_v12 }
 0x264   :  { %2807 = vmatprep.subr.bf16.mxu0 %v3429_v53  ;;  %2832 = vmatprep.subr.bf16.mxu1 %v3307_v32 }
 0x267   :  { %2809 = vmatpush1.bf16.msra.mxu0 %v3435_v59  ;;  %2834 = vmatpush3.bf16.msra.mxu1 %v3464_v17 }
 0x268   :  { %2811 = vmatprep.subr.bf16.mxu0 %v3439_v62  ;;  %2835 = vmatprep.subr.bf16.mxu1 %v3307_v32 }
 0x26b   :  { %2813 = vmatpush1.bf16.msra.mxu0 %v3445_v3  ;;  %2837 = vmatpush3.bf16.msra.mxu1 %v3470_v20 }
 0x26c   :  { %2839 = vmatprep.subr.bf16.mxu0 %v3364_v4  ;;  %2870 = vmatprep.subr.bf16.mxu1 %v3307_v32 }
 0x321   :  { %v763_v28 = vpop.f32.mrb[4].mxu0  ;;  %v834_v61 = vpop.f32.mrb[10].mxu1 }
 0x322   :  { %v839_v47 = vrot.slane %v763_v28, 6  ;;  %v840_v30 = vrot.slane %v763_v28, 7  ;;  %v765_v34 = vpop.f32.mrb[5].mxu0  ;;  %v2403_v48 = vpop.f32.mrb[11].mxu1  ;;  %v876_v19 = vadd.f32 %v3524_v16, %v834_v61 }
 0x323   :  { %v858_v57 = vrot.slane %v765_v34, 6  ;;  %v859_v60 = vrot.slane %v765_v34, 7 }
 0x324   :  { %v843_v51 = vadd.f32 %v839_v47, %v3509_v37  ;;  %v844_v29 = vadd.f32 %v840_v30, %v3511_v42  ;;  %v878_v21 = vrot.slane %v876_v19, 6  ;;  %v879_v23 = vrot.slane %v876_v19, 7 }
 0x325   :  { %v862_v63 = vadd.f32 %v858_v57, %v3515_v54  ;;  %v863_v5 = vadd.f32 %v859_v60, %v3517_v56 }
 0x326   :  { %v2113_v52 = vmul.f32 -1.442695, %v843_v51  ;;  %v2114_v55 = vmul.f32 -1.442695, %v844_v29 }
 0x327   :  { %v2115_v13 = vmul.f32 -1.442695, %v862_v63  ;;  %v2116_v18 = vmul.f32 -1.442695, %v863_v5 }
 0x328   :  { %3134 = vpow2.f32 %v2113_v52 }
 0x329   :  { %3136 = vpow2.f32 %v2114_v55 }
 0x332   :  { %v3135_v1 = vpop.eup %3134 }
 0x333   :  { %v3137_v10 = vpop.eup %3136  ;;  %v851_v11 = vadd.f32 1.0, %v3135_v1 }
 0x334   :  { %v852_v6 = vadd.f32 1.0, %v3137_v10 }
 0x335   :  { %3138 = vrcp.f32 %v851_v11 }
 0x336   :  { %3140 = vrcp.f32 %v852_v6 }
 0x337   :  { %3142 = vpow2.f32 %v2115_v13 }
 0x338   :  { %3144 = vpow2.f32 %v2116_v18 }
 0x33f   :  { %v3139_v22 = vpop.eup %3138 }
 0x340   :  { %v3141_v26 = vpop.eup %3140  ;;  %v882_v27 = vmul.f32 %v3139_v22, %v878_v21 }
 0x341   :  { %v883_v36 = vmul.f32 %v3141_v26, %v879_v23  ;;  %v3143_v46 = vpop.eup %3142 }
 0x342   :  { %v884_v45 = vadd.f32 %v882_v27, %v3527_v33  ;;  %v3145_v47 = vpop.eup %3144  ;;  %v870_v30 = vadd.f32 1.0, %v3143_v46 }
 0x343   :  { %v885_v28 = vadd.f32 %v883_v36, %v3529_v43  ;;  %v871_v34 = vadd.f32 1.0, %v3145_v47 }
 0x344   :  { %3146 = vtanh.f32 %v884_v45 }
 0x345   :  { %3148 = vtanh.f32 %v885_v28 }
 0x346   :  { %3150 = vrcp.f32 %v870_v30 }
 0x347   :  { %3152 = vrcp.f32 %v871_v34 }
 0x34e   :  { %v3147_v61 = vpop.eup %3146 }
 0x34f   :  { %v3149_v48 = vpop.eup %3148  ;;  %v890_v51 = vrot.slane %v3147_v61, 1 }
 0x350   :  { %v891_v29 = vrot.slane %v3149_v48, 1  ;;  %v3151_v60 = vpop.eup %3150 }
 0x351   :  { %v894_v52 = vsub.f32 %v3586_v39, %v890_v51  ;;  %v3153_v1 = vpop.eup %3152 }
 0x352   :  { %v895_v55 = vsub.f32 %v3584_v38, %v891_v29 }
 0x353   :  { %v898_v57 = vrot.slane %v894_v52, 7 }
 0x354   :  { %v899_v63 = vrot.slane %v895_v55, 7 }
 0x355   :  { %v902_v5 = vmul.f32 %v3151_v60, %v898_v57 }
 0x356   :  { %v903_v10 = vmul.f32 %v3153_v1, %v899_v63 }
 0x357   :  { %v3635_v11 = vadd.f32 %v3147_v61, %v902_v5 }
 0x358   :  { %v3637_v6 = vadd.f32 %v3149_v48, %v903_v10 }
 0x359   :  { %v908_v13 = vrot.slane %v3635_v11, 2 }
 0x35a   :  { %v909_v18 = vrot.slane %v3637_v6, 1 }
 0x35c   :  { %v910_v19 = vsel %vm483_vm3, %v909_v18, %v908_v13 }
 0x35d   :  { %977 = vmatmul.mubr.f32.vlgmr.msra.gmra.mrb[6].mxu0 %v910_v19  ;;  %2437 = vmatmul.mubr.f32.vlgmr.msra.gmra.mrb[12].mxu1 %v910_v19 }
 0x35e   :  { %2841 = vmatpush1.bf16.msra.mxu0 %v3366_v8  ;;  %2872 = vmatpush3.bf16.msra.mxu1 %v3410_v40 }
 0x35f   :  { %2843 = vmatprep.subr.bf16.mxu0 %v3368_v9  ;;  %2873 = vmatprep.subr.bf16.mxu1 %v3307_v32 }
 0x360   :  { %1191 = vmatprep.mubr.f32.mxu0 %v3306_v0  ;;  %2471 = vmatprep.mubr.msk.f32.mxu1 %vm3308_vm2, %v3306_v0 }
 0x362   :  { %2845 = vmatpush1.bf16.msra.mxu0 %v3372_v14  ;;  %2875 = vmatpush3.bf16.msra.mxu1 %v3420_v49 }
 0x363   :  { %2847 = vmatprep.subr.bf16.mxu0 %v3375_v15  ;;  %2876 = vmatprep.subr.bf16.mxu1 %v3307_v32 }
 0x366   :  { %2849 = vmatpush1.bf16.msra.mxu0 %v3387_v24  ;;  %2878 = vmatpush3.bf16.msra.mxu1 %v3432_v58 }
 0x367   :  { %2851 = vmatprep.subr.bf16.mxu0 %v3391_v25  ;;  %2879 = vmatprep.subr.bf16.mxu1 %v3307_v32 }
 0x36a   :  { %2853 = vmatpush1.bf16.msra.mxu0 %v3402_v31  ;;  %2881 = vmatpush3.bf16.msra.mxu1 %v3442_v2 }
 0x36b   :  { %2855 = vmatprep.subr.bf16.mxu0 %v3406_v35  ;;  %2882 = vmatprep.subr.bf16.mxu1 %v3307_v32 }
 0x36e   :  { %2857 = vmatpush1.bf16.msra.mxu0 %v3413_v41  ;;  %2884 = vmatpush3.bf16.msra.mxu1 %v3450_v7 }
 0x36f   :  { %2859 = vmatprep.subr.bf16.mxu0 %v3416_v44  ;;  %2885 = vmatprep.subr.bf16.mxu1 %v3307_v32 }
 0x372   :  { %2861 = vmatpush1.bf16.msra.mxu0 %v3425_v50  ;;  %2887 = vmatpush3.bf16.msra.mxu1 %v3457_v12 }
 0x373   :  { %2863 = vmatprep.subr.bf16.mxu0 %v3429_v53  ;;  %2888 = vmatprep.subr.bf16.mxu1 %v3307_v32 }
 0x376   :  { %2865 = vmatpush1.bf16.msra.mxu0 %v3435_v59  ;;  %2890 = vmatpush3.bf16.msra.mxu1 %v3464_v17 }
 0x377   :  { %2867 = vmatprep.subr.bf16.mxu0 %v3439_v62  ;;  %2891 = vmatprep.subr.bf16.mxu1 %v3307_v32 }
 0x37a   :  { %2869 = vmatpush1.bf16.msra.mxu0 %v3445_v3  ;;  %2893 = vmatpush3.bf16.msra.mxu1 %v3470_v20 }
 0x37b   :  { %2895 = vmatprep.subr.bf16.mxu0 %v3364_v4  ;;  %2926 = vmatprep.subr.bf16.mxu1 %v3307_v32 }
 0x430   :  { %v978_v38 = vpop.f32.mrb[6].mxu0  ;;  %v1049_v39 = vpop.f32.mrb[12].mxu1 }
 0x431   :  { %v1054_v21 = vrot.slane %v978_v38, 5  ;;  %v1055_v22 = vrot.slane %v978_v38, 6  ;;  %v980_v23 = vpop.f32.mrb[7].mxu0  ;;  %v2438_v26 = vpop.f32.mrb[13].mxu1  ;;  %v1091_v57 = vadd.f32 %v3524_v16, %v1049_v39 }
 0x432   :  { %v1073_v28 = vrot.slane %v980_v23, 5  ;;  %v1074_v47 = vrot.slane %v980_v23, 6 }
 0x433   :  { %v1058_v27 = vadd.f32 %v1054_v21, %v3509_v37  ;;  %v1059_v36 = vadd.f32 %v1055_v22, %v3511_v42  ;;  %v1093_v60 = vrot.slane %v1091_v57, 5  ;;  %v1094_v1 = vrot.slane %v1091_v57, 6 }
 0x434   :  { %v1077_v30 = vadd.f32 %v1073_v28, %v3515_v54  ;;  %v1078_v61 = vadd.f32 %v1074_v47, %v3517_v56 }
 0x435   :  { %v2117_v45 = vmul.f32 -1.442695, %v1058_v27  ;;  %v2118_v46 = vmul.f32 -1.442695, %v1059_v36 }
 0x436   :  { %v2119_v52 = vmul.f32 -1.442695, %v1077_v30  ;;  %v2120_v55 = vmul.f32 -1.442695, %v1078_v61 }
 0x437   :  { %3154 = vpow2.f32 %v2117_v45 }
 0x438   :  { %3156 = vpow2.f32 %v2118_v46 }
 0x441   :  { %v3155_v34 = vpop.eup %3154 }
 0x442   :  { %v3157_v48 = vpop.eup %3156  ;;  %v1066_v51 = vadd.f32 1.0, %v3155_v34 }
 0x443   :  { %v1067_v29 = vadd.f32 1.0, %v3157_v48 }
 0x444   :  { %3158 = vrcp.f32 %v1066_v51 }
 0x445   :  { %3160 = vrcp.f32 %v1067_v29 }
 0x446   :  { %3162 = vpow2.f32 %v2119_v52 }
 0x447   :  { %3164 = vpow2.f32 %v2120_v55 }
 0x44e   :  { %v3159_v63 = vpop.eup %3158 }
 0x44f   :  { %v3161_v5 = vpop.eup %3160  ;;  %v1097_v10 = vmul.f32 %v3159_v63, %v1093_v60 }
 0x450   :  { %v1098_v13 = vmul.f32 %v3161_v5, %v1094_v1  ;;  %v3163_v19 = vpop.eup %3162 }
 0x451   :  { %v1099_v18 = vadd.f32 %v1097_v10, %v3527_v33  ;;  %v3165_v21 = vpop.eup %3164  ;;  %v1085_v22 = vadd.f32 1.0, %v3163_v19 }
 0x452   :  { %v1100_v38 = vadd.f32 %v1098_v13, %v3529_v43  ;;  %v1086_v23 = vadd.f32 1.0, %v3165_v21 }
 0x453   :  { %3166 = vtanh.f32 %v1099_v18 }
 0x454   :  { %3168 = vtanh.f32 %v1100_v38 }
 0x455   :  { %3170 = vrcp.f32 %v1085_v22 }
 0x456   :  { %3172 = vrcp.f32 %v1086_v23 }
 0x45d   :  { %v3167_v39 = vpop.eup %3166 }
 0x45e   :  { %v3169_v26 = vpop.eup %3168  ;;  %v1105_v27 = vrot.slane %v3167_v39, 1 }
 0x45f   :  { %v1106_v36 = vrot.slane %v3169_v26, 1  ;;  %v3171_v47 = vpop.eup %3170 }
 0x460   :  { %v1109_v45 = vsub.f32 %v3635_v11, %v1105_v27  ;;  %v3173_v34 = vpop.eup %3172 }
 0x461   :  { %v1110_v46 = vsub.f32 %v3637_v6, %v1106_v36 }
 0x462   :  { %v1113_v28 = vrot.slane %v1109_v45, 7 }
 0x463   :  { %v1114_v30 = vrot.slane %v1110_v46, 7 }
 0x464   :  { %v1117_v61 = vmul.f32 %v3171_v47, %v1113_v28 }
 0x465   :  { %v1118_v48 = vmul.f32 %v3173_v34, %v1114_v30 }
 0x466   :  { %v3686_v51 = vadd.f32 %v3167_v39, %v1117_v61 }
 0x467   :  { %v3688_v29 = vadd.f32 %v3169_v26, %v1118_v48 }
 0x468   :  { %v1123_v52 = vrot.slane %v3686_v51, 3 }
 0x469   :  { %v1124_v55 = vrot.slane %v3688_v29, 2 }
 0x46b   :  { %v1125_v57 = vsel %vm483_vm3, %v1124_v55, %v1123_v52 }
 0x46c   :  { %1192 = vmatmul.mubr.f32.vlgmr.msra.gmra.mrb[8].mxu0 %v1125_v57  ;;  %2472 = vmatmul.mubr.f32.vlgmr.msra.gmra.mrb[14].mxu1 %v1125_v57 }
 0x46d   :  { %2897 = vmatpush1.bf16.msra.mxu0 %v3366_v8  ;;  %2928 = vmatpush3.bf16.msra.mxu1 %v3410_v40 }
 0x46e   :  { %2899 = vmatprep.subr.bf16.mxu0 %v3368_v9  ;;  %2929 = vmatprep.subr.bf16.mxu1 %v3307_v32 }
 0x46f   :  { %1406 = vmatprep.mubr.f32.mxu0 %v3306_v0  ;;  %2506 = vmatprep.mubr.msk.f32.mxu1 %vm3308_vm2, %v3306_v0 }
 0x471   :  { %2901 = vmatpush1.bf16.msra.mxu0 %v3372_v14  ;;  %2931 = vmatpush3.bf16.msra.mxu1 %v3420_v49 }
 0x472   :  { %2903 = vmatprep.subr.bf16.mxu0 %v3375_v15  ;;  %2932 = vmatprep.subr.bf16.mxu1 %v3307_v32 }
 0x475   :  { %2905 = vmatpush1.bf16.msra.mxu0 %v3387_v24  ;;  %2934 = vmatpush3.bf16.msra.mxu1 %v3432_v58 }
 0x476   :  { %2907 = vmatprep.subr.bf16.mxu0 %v3391_v25  ;;  %2935 = vmatprep.subr.bf16.mxu1 %v3307_v32 }
 0x479   :  { %2909 = vmatpush1.bf16.msra.mxu0 %v3402_v31  ;;  %2937 = vmatpush3.bf16.msra.mxu1 %v3442_v2 }
 0x47a   :  { %2911 = vmatprep.subr.bf16.mxu0 %v3406_v35  ;;  %2938 = vmatprep.subr.bf16.mxu1 %v3307_v32 }
 0x47d   :  { %2913 = vmatpush1.bf16.msra.mxu0 %v3413_v41  ;;  %2940 = vmatpush3.bf16.msra.mxu1 %v3450_v7 }
 0x47e   :  { %2915 = vmatprep.subr.bf16.mxu0 %v3416_v44  ;;  %2941 = vmatprep.subr.bf16.mxu1 %v3307_v32 }
 0x481   :  { %2917 = vmatpush1.bf16.msra.mxu0 %v3425_v50  ;;  %2943 = vmatpush3.bf16.msra.mxu1 %v3457_v12 }
 0x482   :  { %2919 = vmatprep.subr.bf16.mxu0 %v3429_v53  ;;  %2944 = vmatprep.subr.bf16.mxu1 %v3307_v32 }
 0x485   :  { %2921 = vmatpush1.bf16.msra.mxu0 %v3435_v59  ;;  %2946 = vmatpush3.bf16.msra.mxu1 %v3464_v17 }
 0x486   :  { %2923 = vmatprep.subr.bf16.mxu0 %v3439_v62  ;;  %2947 = vmatprep.subr.bf16.mxu1 %v3307_v32 }
 0x489   :  { %2925 = vmatpush1.bf16.msra.mxu0 %v3445_v3  ;;  %2949 = vmatpush3.bf16.msra.mxu1 %v3470_v20 }
 0x48a   :  { %2951 = vmatprep.subr.bf16.mxu0 %v3364_v4  ;;  %2982 = vmatprep.subr.bf16.mxu1 %v3307_v32 }
 0x53f   :  { %v1193_v11 = vpop.f32.mrb[8].mxu0  ;;  %v1264_v6 = vpop.f32.mrb[14].mxu1 }
 0x540   :  { %v1269_v60 = vrot.slane %v1193_v11, 4  ;;  %v1270_v63 = vrot.slane %v1193_v11, 5  ;;  %v1195_v1 = vpop.f32.mrb[9].mxu0  ;;  %v2473_v5 = vpop.f32.mrb[15].mxu1  ;;  %v1306_v28 = vadd.f32 %v3524_v16, %v1264_v6 }
 0x541   :  { %v1288_v38 = vrot.slane %v1195_v1, 4  ;;  %v1289_v21 = vrot.slane %v1195_v1, 5 }
 0x542   :  { %v1273_v10 = vadd.f32 %v1269_v60, %v3509_v37  ;;  %v1274_v13 = vadd.f32 %v1270_v63, %v3511_v42  ;;  %v1308_v47 = vrot.slane %v1306_v28, 4  ;;  %v1309_v34 = vrot.slane %v1306_v28, 5 }
 0x543   :  { %v1292_v22 = vadd.f32 %v1288_v38, %v3515_v54  ;;  %v1293_v39 = vadd.f32 %v1289_v21, %v3517_v56 }
 0x544   :  { %v2121_v18 = vmul.f32 -1.442695, %v1273_v10  ;;  %v2122_v19 = vmul.f32 -1.442695, %v1274_v13 }
 0x545   :  { %v2123_v45 = vmul.f32 -1.442695, %v1292_v22  ;;  %v2124_v46 = vmul.f32 -1.442695, %v1293_v39 }
 0x546   :  { %3174 = vpow2.f32 %v2121_v18 }
 0x547   :  { %3176 = vpow2.f32 %v2122_v19 }
 0x550   :  { %v3175_v23 = vpop.eup %3174 }
 0x551   :  { %v3177_v26 = vpop.eup %3176  ;;  %v1281_v27 = vadd.f32 1.0, %v3175_v23 }
 0x552   :  { %v1282_v36 = vadd.f32 1.0, %v3177_v26 }
 0x553   :  { %3178 = vrcp.f32 %v1281_v27 }
 0x554   :  { %3180 = vrcp.f32 %v1282_v36 }
 0x555   :  { %3182 = vpow2.f32 %v2123_v45 }
 0x556   :  { %3184 = vpow2.f32 %v2124_v46 }
 0x55d   :  { %v3179_v30 = vpop.eup %3178 }
 0x55e   :  { %v3181_v61 = vpop.eup %3180  ;;  %v1312_v48 = vmul.f32 %v3179_v30, %v1308_v47 }
 0x55f   :  { %v1313_v52 = vmul.f32 %v3181_v61, %v1309_v34  ;;  %v3183_v57 = vpop.eup %3182 }
 0x560   :  { %v1314_v55 = vadd.f32 %v1312_v48, %v3527_v33  ;;  %v3185_v60 = vpop.eup %3184  ;;  %v1300_v63 = vadd.f32 1.0, %v3183_v57 }
 0x561   :  { %v1315_v11 = vadd.f32 %v1313_v52, %v3529_v43  ;;  %v1301_v1 = vadd.f32 1.0, %v3185_v60 }
 0x562   :  { %3186 = vtanh.f32 %v1314_v55 }
 0x563   :  { %3188 = vtanh.f32 %v1315_v11 }
 0x564   :  { %3190 = vrcp.f32 %v1300_v63 }
 0x565   :  { %3192 = vrcp.f32 %v1301_v1 }
 0x56c   :  { %v3187_v6 = vpop.eup %3186 }
 0x56d   :  { %v3189_v5 = vpop.eup %3188  ;;  %v1320_v10 = vrot.slane %v3187_v6, 1 }
 0x56e   :  { %v1321_v13 = vrot.slane %v3189_v5, 1  ;;  %v3191_v21 = vpop.eup %3190 }
 0x56f   :  { %v1324_v18 = vsub.f32 %v3686_v51, %v1320_v10  ;;  %v3193_v23 = vpop.eup %3192 }
 0x570   :  { %v1325_v19 = vsub.f32 %v3688_v29, %v1321_v13 }
 0x571   :  { %v1328_v38 = vrot.slane %v1324_v18, 7 }
 0x572   :  { %v1329_v22 = vrot.slane %v1325_v19, 7 }
 0x573   :  { %v1332_v39 = vmul.f32 %v3191_v21, %v1328_v38 }
 0x574   :  { %v1333_v26 = vmul.f32 %v3193_v23, %v1329_v22 }
 0x575   :  { %v3737_v27 = vadd.f32 %v3187_v6, %v1332_v39 }
 0x576   :  { %v3739_v36 = vadd.f32 %v3189_v5, %v1333_v26 }
 0x577   :  { %v1338_v45 = vrot.slane %v3737_v27, 4 }
 0x578   :  { %v1339_v46 = vrot.slane %v3739_v36, 3 }
 0x57a   :  { %v1340_v28 = vsel %vm483_vm3, %v1339_v46, %v1338_v45 }
 0x57b   :  { %1407 = vmatmul.mubr.f32.vlgmr.msra.gmra.mrb[10].mxu0 %v1340_v28  ;;  %2507 = vmatmul.mubr.f32.vlgmr.msra.gmra.mrb[16].mxu1 %v1340_v28 }
 0x57c   :  { %2953 = vmatpush1.bf16.msra.mxu0 %v3366_v8  ;;  %2984 = vmatpush3.bf16.msra.mxu1 %v3410_v40 }
 0x57d   :  { %2955 = vmatprep.subr.bf16.mxu0 %v3368_v9  ;;  %2985 = vmatprep.subr.bf16.mxu1 %v3307_v32 }
 0x57e   :  { %1621 = vmatprep.mubr.f32.mxu0 %v3306_v0  ;;  %2541 = vmatprep.mubr.msk.f32.mxu1 %vm3308_vm2, %v3306_v0 }
 0x580   :  { %2957 = vmatpush1.bf16.msra.mxu0 %v3372_v14  ;;  %2987 = vmatpush3.bf16.msra.mxu1 %v3420_v49 }
 0x581   :  { %2959 = vmatprep.subr.bf16.mxu0 %v3375_v15  ;;  %2988 = vmatprep.subr.bf16.mxu1 %v3307_v32 }
 0x584   :  { %2961 = vmatpush1.bf16.msra.mxu0 %v3387_v24  ;;  %2990 = vmatpush3.bf16.msra.mxu1 %v3432_v58 }
 0x585   :  { %2963 = vmatprep.subr.bf16.mxu0 %v3391_v25  ;;  %2991 = vmatprep.subr.bf16.mxu1 %v3307_v32 }
 0x588   :  { %2965 = vmatpush1.bf16.msra.mxu0 %v3402_v31  ;;  %2993 = vmatpush3.bf16.msra.mxu1 %v3442_v2 }
 0x589   :  { %2967 = vmatprep.subr.bf16.mxu0 %v3406_v35  ;;  %2994 = vmatprep.subr.bf16.mxu1 %v3307_v32 }
 0x58c   :  { %2969 = vmatpush1.bf16.msra.mxu0 %v3413_v41  ;;  %2996 = vmatpush3.bf16.msra.mxu1 %v3450_v7 }
 0x58d   :  { %2971 = vmatprep.subr.bf16.mxu0 %v3416_v44  ;;  %2997 = vmatprep.subr.bf16.mxu1 %v3307_v32 }
 0x590   :  { %2973 = vmatpush1.bf16.msra.mxu0 %v3425_v50  ;;  %2999 = vmatpush3.bf16.msra.mxu1 %v3457_v12 }
 0x591   :  { %2975 = vmatprep.subr.bf16.mxu0 %v3429_v53  ;;  %3000 = vmatprep.subr.bf16.mxu1 %v3307_v32 }
 0x594   :  { %2977 = vmatpush1.bf16.msra.mxu0 %v3435_v59  ;;  %3002 = vmatpush3.bf16.msra.mxu1 %v3464_v17 }
 0x595   :  { %2979 = vmatprep.subr.bf16.mxu0 %v3439_v62  ;;  %3003 = vmatprep.subr.bf16.mxu1 %v3307_v32 }
 0x598   :  { %2981 = vmatpush1.bf16.msra.mxu0 %v3445_v3  ;;  %3005 = vmatpush3.bf16.msra.mxu1 %v3470_v20 }
 0x599   :  { %3007 = vmatprep.subr.bf16.mxu0 %v3364_v4  ;;  %3038 = vmatprep.subr.bf16.mxu1 %v3307_v32 }
 0x64e   :  { %v1408_v51 = vpop.f32.mrb[10].mxu0  ;;  %v1479_v29 = vpop.f32.mrb[16].mxu1 }
 0x64f   :  { %v1484_v47 = vrot.slane %v1408_v51, 3  ;;  %v1485_v30 = vrot.slane %v1408_v51, 4  ;;  %v1410_v34 = vpop.f32.mrb[11].mxu0  ;;  %v2508_v61 = vpop.f32.mrb[17].mxu1  ;;  %v1521_v19 = vadd.f32 %v3524_v16, %v1479_v29 }
 0x650   :  { %v1503_v11 = vrot.slane %v1410_v34, 3  ;;  %v1504_v60 = vrot.slane %v1410_v34, 4 }
 0x651   :  { %v1488_v48 = vadd.f32 %v1484_v47, %v3509_v37  ;;  %v1489_v52 = vadd.f32 %v1485_v30, %v3511_v42  ;;  %v1523_v38 = vrot.slane %v1521_v19, 3  ;;  %v1524_v22 = vrot.slane %v1521_v19, 4 }
 0x652   :  { %v1507_v4 = vadd.f32 %v1503_v11, %v3515_v54  ;;  %v1508_v1 = vadd.f32 %v1504_v60, %v3517_v56 }
 0x653   :  { %v2125_v55 = vmul.f32 -1.442695, %v1488_v48  ;;  %v2126_v57 = vmul.f32 -1.442695, %v1489_v52 }
 0x654   :  { %v2127_v13 = vmul.f32 -1.442695, %v1507_v4  ;;  %v2128_v18 = vmul.f32 -1.442695, %v1508_v1 }
 0x655   :  { %3194 = vpow2.f32 %v2125_v55 }
 0x656   :  { %3196 = vpow2.f32 %v2126_v57 }
 0x65f   :  { %v3195_v63 = vpop.eup %3194 }
 0x660   :  { %v3197_v6 = vpop.eup %3196  ;;  %v1496_v5 = vadd.f32 1.0, %v3195_v63 }
 0x661   :  { %v1497_v10 = vadd.f32 1.0, %v3197_v6 }
 0x662   :  { %3198 = vrcp.f32 %v1496_v5 }
 0x663   :  { %3200 = vrcp.f32 %v1497_v10 }
 0x664   :  { %3202 = vpow2.f32 %v2127_v13 }
 0x665   :  { %3204 = vpow2.f32 %v2128_v18 }
 0x66c   :  { %v3199_v21 = vpop.eup %3198 }
 0x66d   :  { %v3201_v23 = vpop.eup %3200  ;;  %v1527_v39 = vmul.f32 %v3199_v21, %v1523_v38 }
 0x66e   :  { %v1528_v26 = vmul.f32 %v3201_v23, %v1524_v22  ;;  %v3203_v46 = vpop.eup %3202 }
 0x66f   :  { %v1529_v45 = vadd.f32 %v1527_v39, %v3527_v33  ;;  %v3205_v51 = vpop.eup %3204  ;;  %v1515_v47 = vadd.f32 1.0, %v3203_v46 }
 0x670   :  { %v1530_v28 = vadd.f32 %v1528_v26, %v3529_v43  ;;  %v1516_v30 = vadd.f32 1.0, %v3205_v51 }
 0x671   :  { %3206 = vtanh.f32 %v1529_v45 }
 0x672   :  { %3208 = vtanh.f32 %v1530_v28 }
 0x673   :  { %3210 = vrcp.f32 %v1515_v47 }
 0x674   :  { %3212 = vrcp.f32 %v1516_v30 }
 0x67b   :  { %v3207_v16 = vpop.eup %3206 }
 0x67c   :  { %v3209_v29 = vpop.eup %3208  ;;  %v1535_v34 = vrot.slane %v3207_v16, 1 }
 0x67d   :  { %v1536_v61 = vrot.slane %v3209_v29, 1  ;;  %v3211_v57 = vpop.eup %3210 }
 0x67e   :  { %v1539_v48 = vsub.f32 %v3737_v27, %v1535_v34  ;;  %v3213_v60 = vpop.eup %3212 }
 0x67f   :  { %v1540_v52 = vsub.f32 %v3739_v36, %v1536_v61 }
 0x680   :  { %v1543_v55 = vrot.slane %v1539_v48, 7 }
 0x681   :  { %v1544_v11 = vrot.slane %v1540_v52, 7 }
 0x682   :  { %v1547_v4 = vmul.f32 %v3211_v57, %v1543_v55 }
 0x683   :  { %v1548_v63 = vmul.f32 %v3213_v60, %v1544_v11 }
 0x684   :  { %v3788_v1 = vadd.f32 %v3207_v16, %v1547_v4 }
 0x685   :  { %v3790_v6 = vadd.f32 %v3209_v29, %v1548_v63 }
 0x686   :  { %v1553_v5 = vrot.slane %v3788_v1, 5 }
 0x687   :  { %v1554_v10 = vrot.slane %v3790_v6, 4 }
 0x689   :  { %v1555_v13 = vsel %vm483_vm3, %v1554_v10, %v1553_v5  ;;  %v1983_v10 = vld [vmem:[%s3937_s5 + $0x10] sm:$0xff] }
 0x68a   :  { %1622 = vmatmul.mubr.f32.vlgmr.msra.gmra.mrb[12].mxu0 %v1555_v13  ;;  %2542 = vmatmul.mubr.f32.vlgmr.msra.gmra.mrb[18].mxu1 %v1555_v13 }
 0x68b   :  { %3009 = vmatpush1.bf16.msra.mxu0 %v3366_v8  ;;  %3040 = vmatpush3.bf16.msra.mxu1 %v3410_v40 }
 0x68c   :  { %3011 = vmatprep.subr.bf16.mxu0 %v3368_v9  ;;  %3041 = vmatprep.subr.bf16.mxu1 %v3307_v32 }
 0x68d   :  { %1836 = vmatprep.mubr.f32.mxu0 %v3306_v0  ;;  %2576 = vmatprep.mubr.msk.f32.mxu1 %vm3308_vm2, %v3306_v0 }
 0x68f   :  { %3013 = vmatpush1.bf16.msra.mxu0 %v3372_v14  ;;  %3043 = vmatpush3.bf16.msra.mxu1 %v3420_v49 }
 0x690   :  { %3015 = vmatprep.subr.bf16.mxu0 %v3375_v15  ;;  %3044 = vmatprep.subr.bf16.mxu1 %v3307_v32 }
 0x693   :  { %3017 = vmatpush1.bf16.msra.mxu0 %v3387_v24  ;;  %3046 = vmatpush3.bf16.msra.mxu1 %v3432_v58 }
 0x694   :  { %3019 = vmatprep.subr.bf16.mxu0 %v3391_v25  ;;  %3047 = vmatprep.subr.bf16.mxu1 %v3307_v32 }
 0x697   :  { %3021 = vmatpush1.bf16.msra.mxu0 %v3402_v31  ;;  %3049 = vmatpush3.bf16.msra.mxu1 %v3442_v2 }
 0x698   :  { %3023 = vmatprep.subr.bf16.mxu0 %v3406_v35  ;;  %3050 = vmatprep.subr.bf16.mxu1 %v3307_v32 }
 0x69b   :  { %3025 = vmatpush1.bf16.msra.mxu0 %v3413_v41  ;;  %3052 = vmatpush3.bf16.msra.mxu1 %v3450_v7 }
 0x69c   :  { %3027 = vmatprep.subr.bf16.mxu0 %v3416_v44  ;;  %3053 = vmatprep.subr.bf16.mxu1 %v3307_v32 }
 0x69f   :  { %3029 = vmatpush1.bf16.msra.mxu0 %v3425_v50  ;;  %3055 = vmatpush3.bf16.msra.mxu1 %v3457_v12  ;;  %v3836_v12 = vld [vmem:[%s3936_s4] ss:$0 sm:$0xff] }
 0x6a0   :  { %3031 = vmatprep.subr.bf16.mxu0 %v3429_v53  ;;  %3056 = vmatprep.subr.bf16.mxu1 %v3307_v32 }
 0x6a3   :  { %3033 = vmatpush1.bf16.msra.mxu0 %v3435_v59  ;;  %3058 = vmatpush3.bf16.msra.mxu1 %v3464_v17 }
 0x6a4   :  { %3035 = vmatprep.subr.bf16.mxu0 %v3439_v62  ;;  %3059 = vmatprep.subr.bf16.mxu1 %v3307_v32 }
 0x6a7   :  { %3037 = vmatpush1.bf16.msra.mxu0 %v3445_v3  ;;  %3061 = vmatpush3.bf16.msra.mxu1 %v3470_v20 }
 0x6a8   :  { %3062 = vmatprep.subr.bf16.mxu0 %v3307_v32 }
 0x75d   :  { %v1623_v8 = vpop.f32.mrb[12].mxu0  ;;  %v1694_v9 = vpop.f32.mrb[18].mxu1 }
 0x75e   :  { %v1699_v14 = vrot.slane %v1623_v8, 2  ;;  %v1700_v15 = vrot.slane %v1623_v8, 3  ;;  %v1625_v24 = vpop.f32.mrb[13].mxu0  ;;  %v2543_v25 = vpop.f32.mrb[19].mxu1  ;;  %v1736_v17 = vadd.f32 %v3836_v12, %v1694_v9  ;;  %v1985_v8 = vld [vmem:[%s3937_s5 + $0x20] sm:$0xff]  ;;  %v1986_v9 = vld [vmem:[%s3937_s5 + $0x28] sm:$0xff] }
 0x75f   :  { %v1718_v44 = vrot.slane %v1625_v24, 2  ;;  %v1719_v49 = vrot.slane %v1625_v24, 3  ;;  %v1988_v24 = vld [vmem:[%s3937_s5 + $0x38] sm:$0xff] }
 0x760   :  { %v1703_v31 = vadd.f32 %v1699_v14, %v3509_v37  ;;  %v1704_v35 = vadd.f32 %v1700_v15, %v3511_v42  ;;  %v1738_v20 = vrot.slane %v1736_v17, 2  ;;  %v1739_v36 = vrot.slane %v1736_v17, 3  ;;  %v1987_v15 = vld [vmem:[%s3937_s5 + $0x30] sm:$0xff] }
 0x761   :  { %v1722_v50 = vadd.f32 %v1718_v44, %v3515_v54  ;;  %v1723_v58 = vadd.f32 %v1719_v49, %v3517_v56  ;;  %v3069_v14 = vpack.c.bf16 %v1986_v9, %v1985_v8  ;;  %v3072_v25 = vpack.c.bf16 %v1988_v24, %v1987_v15  ;;  %v1992_v44 = vld [vmem:[%s3937_s5 + $0x58] sm:$0xff] }
 0x762   :  { %v2129_v40 = vmul.f32 -1.442695, %v1703_v31  ;;  %v2130_v41 = vmul.f32 -1.442695, %v1704_v35  ;;  %v1989_v31 = vld [vmem:[%s3937_s5 + $0x40] sm:$0xff]  ;;  %v1990_v35 = vld [vmem:[%s3937_s5 + $0x48] sm:$0xff] }
 0x763   :  { %v2131_v3 = vmul.f32 -1.442695, %v1722_v50  ;;  %v2132_v7 = vmul.f32 -1.442695, %v1723_v58  ;;  %v1993_v50 = vld [vmem:[%s3937_s5 + $0x60] sm:$0xff] }
 0x764   :  { %3214 = vpow2.f32 %v2129_v40  ;;  %v3075_v40 = vpack.c.bf16 %v1990_v35, %v1989_v31  ;;  %v2137_v31 = vld [vmem:[%s3938_s6] ss:$0 sm:$0xff] }
 0x765   :  { %3216 = vpow2.f32 %v2130_v41  ;;  %v1991_v41 = vld [vmem:[%s3937_s5 + $0x50] sm:$0xff] }
 0x766   :  { %v3078_v49 = vpack.c.bf16 %v1992_v44, %v1991_v41 }
 0x76e   :  { %v3215_v53 = vpop.eup %3214 }
 0x76f   :  { %v3217_v59 = vpop.eup %3216  ;;  %v1711_v62 = vadd.f32 1.0, %v3215_v53  ;;  %v1994_v53 = vld [vmem:[%s3937_s5 + $0x68] sm:$0xff] }
 0x770   :  { %v1712_v2 = vadd.f32 1.0, %v3217_v59  ;;  %v3081_v58 = vpack.c.bf16 %v1994_v53, %v1993_v50  ;;  %v1995_v59 = vld [vmem:[%s3937_s5 + $0x70] sm:$0xff] }
 0x771   :  { %3218 = vrcp.f32 %v1711_v62  ;;  %v1996_v62 = vld [vmem:[%s3937_s5 + $0x78] sm:$0xff] }
 0x772   :  { %3220 = vrcp.f32 %v1712_v2  ;;  %v3084_v2 = vpack.c.bf16 %v1996_v62, %v1995_v59 }
 0x773   :  { %3222 = vpow2.f32 %v2131_v3 }
 0x774   :  { %3224 = vpow2.f32 %v2132_v7 }
 0x77b   :  { %v3219_v27 = vpop.eup %3218 }
 0x77c   :  { %v3221_v18 = vpop.eup %3220  ;;  %v1742_v19 = vmul.f32 %v3219_v27, %v1738_v20 }
 0x77d   :  { %v1743_v38 = vmul.f32 %v3221_v18, %v1739_v36  ;;  %v3223_v22 = vpop.eup %3222 }
 0x77e   :  { %v1744_v21 = vadd.f32 %v1742_v19, %v3527_v33  ;;  %v3225_v39 = vpop.eup %3224  ;;  %v1730_v26 = vadd.f32 1.0, %v3223_v22 }
 0x77f   :  { %v1745_v23 = vadd.f32 %v1743_v38, %v3529_v43  ;;  %v1731_v45 = vadd.f32 1.0, %v3225_v39 }
 0x780   :  { %3226 = vtanh.f32 %v1744_v21 }
 0x781   :  { %3228 = vtanh.f32 %v1745_v23 }
 0x782   :  { %3230 = vrcp.f32 %v1730_v26 }
 0x783   :  { %3232 = vrcp.f32 %v1731_v45 }
 0x78a   :  { %v3227_v46 = vpop.eup %3226 }
 0x78b   :  { %v3229_v28 = vpop.eup %3228  ;;  %v1750_v51 = vrot.slane %v3227_v46, 1 }
 0x78c   :  { %v1751_v47 = vrot.slane %v3229_v28, 1  ;;  %v3231_v34 = vpop.eup %3230 }
 0x78d   :  { %v1754_v30 = vsub.f32 %v3788_v1, %v1750_v51  ;;  %v3233_v48 = vpop.eup %3232  ;;  %v1981_v1 = vld [vmem:[%s3937_s5] sm:$0xff] }
 0x78e   :  { %v1755_v16 = vsub.f32 %v3790_v6, %v1751_v47  ;;  %v1982_v6 = vld [vmem:[%s3937_s5 + $0x8] sm:$0xff] }
 0x78f   :  { %v1758_v29 = vrot.slane %v1754_v30, 7  ;;  %v3063_v5 = vpack.c.bf16 %v1982_v6, %v1981_v1 }
 0x790   :  { %v1759_v61 = vrot.slane %v1755_v16, 7 }
 0x791   :  { %v1762_v52 = vmul.f32 %v3231_v34, %v1758_v29 }
 0x792   :  { %v1763_v55 = vmul.f32 %v3233_v48, %v1759_v61 }
 0x793   :  { %v3843_v57 = vadd.f32 %v3227_v46, %v1762_v52 }
 0x794   :  { %v3845_v11 = vadd.f32 %v3229_v28, %v1763_v55 }
 0x795   :  { %v1768_v60 = vrot.slane %v3843_v57, 6 }
 0x796   :  { %v1769_v4 = vrot.slane %v3845_v11, 5 }
 0x798   :  { %v1770_v63 = vsel %vm483_vm3, %v1769_v4, %v1768_v60 }
 0x799   :  { %1837 = vmatmul.mubr.f32.vlgmr.msra.gmra.mrb[14].mxu0 %v1770_v63  ;;  %2577 = vmatmul.mubr.f32.vlgmr.msra.gmra.mrb[20].mxu1 %v1770_v63 }
 0x79a   :  { %2611 = vmatprep.mubr.msk.f32.mxu0 %vm3308_vm2, %v3306_v0  ;;  %3064 = vmatpush3.bf16.msra.mxu0 %v3063_v5  ;;  %v1984_v0 = vld [vmem:[%s3937_s5 + $0x18] sm:$0xff] }
 0x79b   :  { %3065 = vmatprep.subr.bf16.mxu0 %v3307_v32  ;;  %v3066_v13 = vpack.c.bf16 %v1984_v0, %v1983_v10 }
 0x79e   :  { %3067 = vmatpush3.bf16.msra.mxu0 %v3066_v13 }
 0x79f   :  { %3068 = vmatprep.subr.bf16.mxu0 %v3307_v32 }
 0x7a2   :  { %3070 = vmatpush3.bf16.msra.mxu0 %v3069_v14 }
 0x7a3   :  { %3071 = vmatprep.subr.bf16.mxu0 %v3307_v32 }
 0x7a6   :  { %3073 = vmatpush3.bf16.msra.mxu0 %v3072_v25 }
 0x7a7   :  { %3074 = vmatprep.subr.bf16.mxu0 %v3307_v32 }
 0x7aa   :  { %3076 = vmatpush3.bf16.msra.mxu0 %v3075_v40 }
 0x7ab   :  { %3077 = vmatprep.subr.bf16.mxu0 %v3307_v32 }
 0x7ae   :  { %3079 = vmatpush3.bf16.msra.mxu0 %v3078_v49 }
 0x7af   :  { %3080 = vmatprep.subr.bf16.mxu0 %v3307_v32 }
 0x7b2   :  { %3082 = vmatpush3.bf16.msra.mxu0 %v3081_v58 }
 0x7b3   :  { %3083 = vmatprep.subr.bf16.mxu0 %v3307_v32 }
 0x7b6   :  { %3085 = vmatpush3.bf16.msra.mxu0 %v3084_v2 }
 0x86c   :  { %v1838_v3 = vpop.f32.mrb[14].mxu0  ;;  %v1909_v7 = vpop.f32.mrb[20].mxu1 }
 0x86d   :  { %v1914_v17 = vrot.slane %v1838_v3, 1  ;;  %v1915_v20 = vrot.slane %v1838_v3, 2  ;;  %v1840_v27 = vpop.f32.mrb[15].mxu0  ;;  %v2578_v36 = vpop.f32.mrb[21].mxu1 }
 0x86e   :  { %v1933_v22 = vrot.slane %v1840_v27, 1  ;;  %v1934_v23 = vrot.slane %v1840_v27, 2 }
 0x86f   :  { %v1918_v18 = vadd.f32 %v1914_v17, %v3509_v37  ;;  %v1919_v19 = vadd.f32 %v1915_v20, %v3511_v42  ;;  %v1951_v42 = vadd.f32 %v3836_v12, %v1909_v7 }
 0x870   :  { %v1937_v39 = vadd.f32 %v1933_v22, %v3515_v54  ;;  %v1938_v26 = vadd.f32 %v1934_v23, %v3517_v56 }
 0x871   :  { %v2133_v38 = vmul.f32 -1.442695, %v1918_v18  ;;  %v2134_v21 = vmul.f32 -1.442695, %v1919_v19  ;;  %v1953_v47 = vrot.slane %v1951_v42, 1  ;;  %v1954_v16 = vrot.slane %v1951_v42, 2 }
 0x872   :  { %v2135_v51 = vmul.f32 -1.442695, %v1937_v39  ;;  %v2136_v37 = vmul.f32 -1.442695, %v1938_v26 }
 0x873   :  { %3234 = vpow2.f32 %v2133_v38 }
 0x874   :  { %3236 = vpow2.f32 %v2134_v21 }
 0x87d   :  { %v3235_v32 = vpop.eup %3234 }
 0x87e   :  { %v3237_v45 = vpop.eup %3236  ;;  %v1926_v46 = vadd.f32 1.0, %v3235_v32 }
 0x87f   :  { %v1927_v28 = vadd.f32 1.0, %v3237_v45 }
 0x880   :  { %3238 = vrcp.f32 %v1926_v46 }
 0x881   :  { %3240 = vrcp.f32 %v1927_v28 }
 0x882   :  { %3242 = vpow2.f32 %v2135_v51 }
 0x883   :  { %3244 = vpow2.f32 %v2136_v37 }
 0x88a   :  { %v3239_v30 = vpop.eup %3238 }
 0x88b   :  { %v3241_v29 = vpop.eup %3240  ;;  %v1957_v34 = vmul.f32 %v3239_v30, %v1953_v47 }
 0x88c   :  { %v1958_v54 = vmul.f32 %v3241_v29, %v1954_v16  ;;  %v3243_v56 = vpop.eup %3242 }
 0x88d   :  { %v1959_v61 = vadd.f32 %v1957_v34, %v3527_v33  ;;  %v3245_v52 = vpop.eup %3244  ;;  %v1945_v55 = vadd.f32 1.0, %v3243_v56 }
 0x88e   :  { %v1960_v48 = vadd.f32 %v1958_v54, %v3529_v43  ;;  %v1946_v60 = vadd.f32 1.0, %v3245_v52 }
 0x88f   :  { %3246 = vtanh.f32 %v1959_v61 }
 0x890   :  { %3248 = vtanh.f32 %v1960_v48 }
 0x891   :  { %3250 = vrcp.f32 %v1945_v55 }
 0x892   :  { %3252 = vrcp.f32 %v1946_v60 }
 0x899   :  { %v3247_v12 = vpop.eup %3246 }
 0x89a   :  { %v3249_v4 = vpop.eup %3248  ;;  %v1965_v63 = vrot.slane %v3247_v12, 1 }
 0x89b   :  { %v1966_v1 = vrot.slane %v3249_v4, 1  ;;  %v3251_v33 = vpop.eup %3250 }
 0x89c   :  { %v1969_v6 = vsub.f32 %v3843_v57, %v1965_v63  ;;  %v3253_v13 = vpop.eup %3252 }
 0x89d   :  { %v1970_v5 = vsub.f32 %v3845_v11, %v1966_v1 }
 0x89e   :  { %v1973_v10 = vrot.slane %v1969_v6, 7 }
 0x89f   :  { %v1974_v0 = vrot.slane %v1970_v5, 7 }
 0x8a0   :  { %v1977_v43 = vmul.f32 %v3251_v33, %v1973_v10 }
 0x8a1   :  { %v1978_v8 = vmul.f32 %v3253_v13, %v1974_v0 }
 0x8a2   :  { %v1979_v9 = vadd.f32 %v3247_v12, %v1977_v43 }
 0x8a3   :  { %v1980_v14 = vadd.f32 %v3249_v4, %v1978_v8 }
 0x8a4   :  { %v2006_v15 = vrot.slane %v1979_v9, 7 }
 0x8a5   :  { %v2007_v24 = vrot.slane %v1980_v14, 6 }
 0x8a7   :  { %v2008_v25 = vsel %vm483_vm3, %v2007_v24, %v2006_v15 }
 0x8a8   :  { %2612 = vmatmul.mubr.f32.vlgmr.msra.gmra.mrb[16].mxu0 %v2008_v25 }
 0x97b   :  { %v2076_v57 = vpop.f32.mrb[16].mxu0 }
 0x97c   :  { %v2077_v11 = vadd.f32 %v2137_v31, %v2076_v57  ;;  %v2613_v35 = vpop.f32.mrb[17].mxu0 }
 0x97e   :  { %2081 = vst.msk [vmem:[#allocation5] sm:$0x3] %vm2080_vm4, %v2077_v11 }
 0x97f   :  { %3288 = shalt.err (!%p3285_p12)
}
 0x980   :  { %s3289_s11 = scalar_lea.hbm %s3939_s7, 32 }
 0x981   :  { %p3290_p13 = scmp.ne.s32.totalorder %s3939_s7, %s3289_s11  ;;  %p3293_p0 = scmp.lt.u32.totalorder %s3289_s11, %s3939_s7 }
 0x983   :  { %p3295_p1 = pnand %p3293_p0, %p3290_p13 }
 0x985   :  { %3298 = shalt.err (!%p3295_p1)
}
 0x986   :  { %2091 = dma.vmem_to_hbm [thread:$0]  %s2089_s30, 32, %s3939_s7, [#allocation4]  }
 0x987   :  { %3301 = dma.done.wait [#allocation4], 32  }
 0x988   :  { %3302 = vsyncadd [#allocation4], 4294967264 }
 0x989   :  { %2095 = vsyncpa [#allocation3], 1 }
 0x98a   :  { %2096 = vsyncpa [#allocation4], 1 }

</bundles_post_ra>
